<compile_context>
chip_gen: v6e
topology: v6e:2x2x1
jax: 0.10.0
libtpu: 0.0.40
codegen_flags: <defaults>
</compile_context>

<pallas_src>
import functools

import jax
import jax.numpy as jnp
from jax import lax
from jax.experimental import pallas as pl
from jax.experimental.pallas import tpu as pltpu


def _round_up(x, m):
    return ((x + m - 1) // m) * m


def _tpu_vmem_budget_bytes():
    """Physical VMEM minus headroom for Mosaic internal scratch / spills."""
    try:
        cap = int(pltpu.get_tpu_info().vmem_capacity_bytes)
    except Exception:
        cap = 64 * 2**20          # conservative (v7x-sized) default
    return max(32 * 2**20, cap - 12 * 2**20)


def _tpu_num_tensorcores():
    """Best-effort TensorCores-per-chip query (2 on v7x, 1 on v5e/v6e)."""
    try:
        info = pltpu.get_tpu_info()
        for name in ("num_cores", "core_count", "num_tensorcores",
                     "tensorcores_per_chip", "cores_per_chip"):
            v = getattr(info, name, None)
            if isinstance(v, int) and v > 0:
                return v
    except Exception:
        pass
    try:
        dev = jax.devices()[0]
        for name in ("num_cores", "core_count"):
            v = getattr(dev, name, None)
            if isinstance(v, int) and v > 0:
                return v
    except Exception:
        pass
    return 1


def _single_buffered_spec(shape, index_map):
    """Grid-resident / slowly-varying operand: single-buffer it."""
    try:
        return pl.BlockSpec(shape, index_map, pipeline_mode=pl.Buffered(1))
    except Exception:   # older jax without pipeline_mode / Buffered
        return pl.BlockSpec(shape, index_map)


def _layer_vmem_bytes(ts, bb, ip, hp, act_bytes=2):
    """VMEM estimate for one layer's pallas_call at a given time chunk."""
    return int(
        2 * ts * bb * ip * act_bytes        # x chunk, double-buffered (bf16)
        + 2 * ts * bb * hp * act_bytes      # hseq chunk, double-buffered (bf16)
        + (ip + hp) * 4 * hp * 2            # bf16 W_ih + W_hh, single-buffered
        + 4 * hp * 4                        # bias (f32)
        + 8 * bb * hp * 4                   # h0/c0/hout/cout + h/c carries (f32)
        + ts * bb * 4 * hp * 4              # gx scratch (f32)
        + (2 << 20))                        # headroom


def _auto_unroll(requested, ts, bb, hp):
    """Cap the timestep-loop unroll when the per-step live set would spill."""
    live_vregs = (bb * hp * 4 * 12) // 4096   # gates + activations + carries
    if live_vregs >= 96:
        cap = 2
    elif live_vregs >= 48:
        cap = 4
    else:
        cap = requested
    return max(1, min(requested, cap, ts))


# ----------------------------------------------------------------------------
# Pallas kernel: one LSTM layer, one (batch block, time chunk) grid step
# ----------------------------------------------------------------------------
def _lstm_layer_kernel(x_ref, wih_ref, whh_ref, b_ref, h0_ref, c0_ref,
                       hseq_ref, hout_ref, cout_ref,
                       h_scr, c_scr, gx_scr,
                       *, seq_len, chunk, hidden_pad, unroll, needs_mask):
    """Shapes (all padded):
      x_ref   : (TS, Bb, Ip) bf16   input chunk (time-major)
      wih_ref : (Ip, 4*Hp)   bf16   input->gates weights (resident)
      whh_ref : (Hp, 4*Hp)   bf16   hidden->gates weights (resident)
      b_ref   : (1, 4*Hp)    f32    combined bias (resident)
      h0_ref  : (Bb, Hp)     f32    initial hidden state for this batch block
      c0_ref  : (Bb, Hp)     f32    initial cell state for this batch block
      hseq_ref: (TS, Bb, Hp) bf16   output hidden chunk
      hout_ref: (Bb, Hp)     f32    final hidden (block resident across time)
      cout_ref: (Bb, Hp)     f32    final cell   (block resident across time)
      h_scr/c_scr : (Bb, Hp) f32    carry scratch, persists across time chunks
      gx_scr  : (TS*Bb, 4*Hp) f32   hoisted input projection for this chunk
    """
    s = pl.program_id(1)
    TS, Bb, Ip = x_ref.shape
    Hp = hidden_pad

    # Initialize the carry at the start of each batch block's time sweep.
    # NOTE: relies on the time axis (grid axis 1) being the innermost,
    # row-major-iterated ("arbitrary") axis -- do not reorder the grid.
    @pl.when(s == 0)
    def _init():
        h_scr[...] = h0_ref[...]
        c_scr[...] = c0_ref[...]

    def chunk_body():
        # Hoisted input projection: one big (TS*Bb, Ip)x(Ip, 4*Hp) MXU matmul.
        x2d = x_ref[...].reshape(TS * Bb, Ip)
        gx = jnp.dot(x2d, wih_ref[...], preferred_element_type=jnp.float32)
        gx_scr[...] = gx + b_ref[...]

        whh = whh_ref[...]

        def step(t, carry):
            h, c = carry
            row = pl.multiple_of(t * Bb, Bb)
            gates = gx_scr[pl.ds(row, Bb), :] + jnp.dot(
                h.astype(whh.dtype), whh, preferred_element_type=jnp.float32)
            # Hp is a multiple of 128, so every gate slice is lane-aligned.
            i_g = jax.nn.sigmoid(gates[:, 0 * Hp:1 * Hp])
            f_g = jax.nn.sigmoid(gates[:, 1 * Hp:2 * Hp])
            g_g = jnp.tanh(gates[:, 2 * Hp:3 * Hp])
            o_g = jax.nn.sigmoid(gates[:, 3 * Hp:4 * Hp])
            c_new = f_g * c + i_g * g_g
            h_new = o_g * jnp.tanh(c_new)
            if needs_mask:  # only the straddling chunk actually needs this
                valid = (s * chunk + t) < seq_len
                h_new = jnp.where(valid, h_new, h)
                c_new = jnp.where(valid, c_new, c)
            hseq_ref[t] = h_new.astype(hseq_ref.dtype)
            return (h_new, c_new)

        h_fin, c_fin = lax.fori_loop(0, TS, step, (h_scr[...], c_scr[...]),
                                     unroll=unroll)
        h_scr[...] = h_fin
        c_scr[...] = c_fin
        # (b, 0) output blocks stay VMEM-resident across the time sweep; HBM
        # writeback happens once when the batch block changes / grid ends.
        hout_ref[...] = h_fin
        cout_ref[...] = c_fin

    if needs_mask:
        # Skip fully-padded time chunks entirely (no MXU/EUP work).
        pl.when(s * chunk < seq_len)(chunk_body)
    else:
        chunk_body()


def _run_lstm_layer(x_tm, w_ih_t, w_hh_t, bias, h0, c0, *,
                    seq_len, hidden_pad, time_chunk, batch_block, unroll,
                    vmem_budget):
    """x_tm: (S_pad, B_pad, Ip) time-major padded bf16 input.

    Returns (hseq (S_pad, B_pad, Hp) bf16, h (B_pad, Hp) f32, c (B_pad, Hp) f32).
    """
    S_pad, B_pad, Ip = x_tm.shape
    Hp = hidden_pad
    TS = time_chunk
    Bb = batch_block
    nb = B_pad // Bb
    ns = S_pad // TS
    needs_mask = (seq_len != S_pad)

    kernel = functools.partial(
        _lstm_layer_kernel, seq_len=seq_len, chunk=TS, hidden_pad=Hp,
        unroll=max(1, min(unroll, TS)), needs_mask=needs_mask)

    grid_spec = pltpu.PrefetchScalarGridSpec(
        num_scalar_prefetch=0,
        grid=(nb, ns),
        in_specs=[
            pl.BlockSpec((TS, Bb, Ip), lambda b, s: (s, b, 0)),       # x chunk
            _single_buffered_spec((Ip, 4 * Hp), lambda b, s: (0, 0)),  # W_ih^T
            _single_buffered_spec((Hp, 4 * Hp), lambda b, s: (0, 0)),  # W_hh^T
            _single_buffered_spec((1, 4 * Hp), lambda b, s: (0, 0)),   # bias
            _single_buffered_spec((Bb, Hp), lambda b, s: (b, 0)),      # h0
            _single_buffered_spec((Bb, Hp), lambda b, s: (b, 0)),      # c0
        ],
        out_specs=(
            pl.BlockSpec((TS, Bb, Hp), lambda b, s: (s, b, 0)),       # hseq
            pl.BlockSpec((Bb, Hp), lambda b, s: (b, 0)),              # final h
            pl.BlockSpec((Bb, Hp), lambda b, s: (b, 0)),              # final c
        ),
        scratch_shapes=[
            pltpu.VMEM((Bb, Hp), jnp.float32),            # h carry
            pltpu.VMEM((Bb, Hp), jnp.float32),            # c carry
            pltpu.VMEM((TS * Bb, 4 * Hp), jnp.float32),   # per-chunk x@W_ih + b
        ],
    )

    vmem_est = _layer_vmem_bytes(TS, Bb, Ip, Hp, x_tm.dtype.itemsize)
    cost = pl.CostEstimate(
        flops=int(2 * S_pad * B_pad * (Ip + Hp) * 4 * Hp),
        transcendentals=int(5 * S_pad * B_pad * Hp),
        bytes_accessed=int(
            x_tm.size * x_tm.dtype.itemsize
            + 2 * S_pad * B_pad * Hp
            + w_ih_t.size * w_ih_t.dtype.itemsize
            + w_hh_t.size * w_hh_t.dtype.itemsize),
    )

    return pl.pallas_call(
        kernel,
        out_shape=(
            jax.ShapeDtypeStruct((S_pad, B_pad, Hp), jnp.bfloat16),
            jax.ShapeDtypeStruct((B_pad, Hp), jnp.float32),
            jax.ShapeDtypeStruct((B_pad, Hp), jnp.float32),
        ),
        grid_spec=grid_spec,
        compiler_params=pltpu.CompilerParams(
            dimension_semantics=("parallel", "arbitrary"),
            vmem_limit_bytes=int(min(max(vmem_est, 32 * 2**20), vmem_budget)),
        ),
        cost_estimate=cost,
    )(x_tm, w_ih_t, w_hh_t, bias, h0, c0)


# ----------------------------------------------------------------------------
# MultiLayerLSTM wrapper (mirrors the PyTorch module's forward)
# ----------------------------------------------------------------------------
class MultiLayerLSTM:
    def __init__(self, input_size, hidden_size, num_layers=1, key=None,
                 time_chunk=None, batch_block=None, unroll=8,
                 mxu_dtype=jnp.bfloat16):
        self.input_size = input_size
        self.hidden_size = hidden_size
        self.num_layers = num_layers
        self.time_chunk = time_chunk      # None => auto-sized to VMEM budget
        self.batch_block = batch_block    # None => auto (split across 2 TCs)
        self.unroll = unroll
        self.hidden_pad = _round_up(hidden_size, 128)   # lane-aligned per gate
        self.input_pad = _round_up(input_size, 128)

        if key is None:
            key = jax.random.PRNGKey(0)
        H, Hp = hidden_size, self.hidden_pad
        bound = 1.0 / (hidden_size ** 0.5)
        self.params = []
        for layer in range(num_layers):
            in_sz = input_size if layer == 0 else hidden_size
            in_pad = self.input_pad if layer == 0 else Hp
            key, k1, k2, k3, k4 = jax.random.split(key, 5)
            # PyTorch-style shapes: W_ih (4H, in), W_hh (4H, H), biases (4H,)
            w_ih = jax.random.uniform(k1, (4 * H, in_sz), minval=-bound,
                                      maxval=bound, dtype=jnp.float32)
            w_hh = jax.random.uniform(k2, (4 * H, H), minval=-bound,
                                      maxval=bound, dtype=jnp.float32)
            b_ih = jax.random.uniform(k3, (4 * H,), minval=-bound,
                                      maxval=bound, dtype=jnp.float32)
            b_hh = jax.random.uniform(k4, (4 * H,), minval=-bound,
                                      maxval=bound, dtype=jnp.float32)
            b = b_ih + b_hh

            # Kernel weights: transposed, gate-blocked so each gate spans a full
            # Hp-lane slab, zero-padded, bf16 for the MXU.
            wih_t = jnp.zeros((in_pad, 4, Hp), jnp.float32)
            wih_t = wih_t.at[:in_sz, :, :H].set(
                jnp.transpose(w_ih.reshape(4, H, in_sz), (2, 0, 1)))
            wih_t = wih_t.reshape(in_pad, 4 * Hp).astype(mxu_dtype)

            whh_t = jnp.zeros((Hp, 4, Hp), jnp.float32)
            whh_t = whh_t.at[:H, :, :H].set(
                jnp.transpose(w_hh.reshape(4, H, H), (2, 0, 1)))
            whh_t = whh_t.reshape(Hp, 4 * Hp).astype(mxu_dtype)

            bias_k = jnp.zeros((4, Hp), jnp.float32)
            bias_k = bias_k.at[:, :H].set(b.reshape(4, H))
            bias_k = bias_k.reshape(1, 4 * Hp)

            self.params.append(dict(
                wih_t=wih_t, whh_t=whh_t, bias_k=bias_k,
                # originals kept for the pure-JAX reference check
                w_ih=w_ih, w_hh=w_hh, b=b))

    def __call__(self, input_seq, h_0=None, c_0=None):
        """input_seq: (B, S, input_size). Returns the last layer's
        (hidden_seq (B,S,H), h (B,H), c (B,H)), matching the PyTorch forward."""
        B, S, I = input_seq.shape
        H, Hp = self.hidden_size, self.hidden_pad
        Bp = _round_up(B, 16)   # sublane-dense bf16 activation stores

        vmem_budget = _tpu_vmem_budget_bytes()

        # Batch block: split across TensorCores when the chip has 2 TCs and the
        # batch is big enough to keep the recurrent matmul's M >= 16 per core.
        if self.batch_block is not None:
            Bb = _round_up(min(self.batch_block, Bp), 16)
            if Bp % Bb != 0:
                Bb = Bp
        else:
            n_tc = _tpu_num_tensorcores()
            if n_tc >= 2 and Bp >= 32:
                Bb = _round_up(-(-Bp // n_tc), 16)
                if Bp % Bb != 0:
                    Bb = Bp
            else:
                Bb = Bp

        # Time chunk: biggest that fits the per-generation VMEM budget
        # (v7x ~52 MiB vs v5e/v6e ~116 MiB), amortizing per-grid-step overhead
        # and bounding the f32 gx scratch.
        max_ip = max(self.input_pad, Hp)
        if self.time_chunk is not None:
            TS = max(1, min(self.time_chunk, _round_up(S, 8)))
        else:
            TS = min(128, max(8, _round_up(S, 8)))
            while TS > 8 and _layer_vmem_bytes(TS, Bb, max_ip, Hp) > int(
                    0.85 * vmem_budget):
                TS //= 2
        S_pad = _round_up(S, TS)

        unroll = _auto_unroll(self.unroll, TS, Bb, Hp)

        if h_0 is None:
            h_0 = jnp.zeros((self.num_layers, B, H), jnp.float32)
        if c_0 is None:
            c_0 = jnp.zeros((self.num_layers, B, H), jnp.float32)
        h0_pad = jnp.pad(h_0.astype(jnp.float32),
                         ((0, 0), (0, Bp - B), (0, Hp - H)))
        c0_pad = jnp.pad(c_0.astype(jnp.float32),
                         ((0, 0), (0, Bp - B), (0, Hp - H)))

        # Time-major, bf16, padded layout for the kernels (single layout pass).
        x_tm = jnp.transpose(input_seq.astype(jnp.bfloat16), (1, 0, 2))
        x_tm = jnp.pad(x_tm, ((0, S_pad - S), (0, Bp - B),
                              (0, self.input_pad - I)))

        hseq, h_fin, c_fin = x_tm, None, None
        for layer in range(self.num_layers):
            p = self.params[layer]
            hseq, h_fin, c_fin = _run_lstm_layer(
                hseq, p["wih_t"], p["whh_t"], p["bias_k"],
                h0_pad[layer], c0_pad[layer],
                seq_len=S, hidden_pad=Hp, time_chunk=TS,
                batch_block=Bb, unroll=unroll, vmem_budget=vmem_budget)

        hidden_seq = jnp.transpose(hseq[:S, :B, :H], (1, 0, 2)).astype(
            jnp.float32)
        return hidden_seq, h_fin[:B, :H], c_fin[:B, :H]


# ----------------------------------------------------------------------------
# Pure-JAX f32 reference for a correctness sanity check
# ----------------------------------------------------------------------------
def _reference_forward(model, input_seq):
    B, S, _ = input_seq.shape
    H = model.hidden_size
    x = input_seq.astype(jnp.float32)
    h = c = None
    for layer in range(model.num_layers):
        p = model.params[layer]
        h = jnp.zeros((B, H), jnp.float32)
        c = jnp.zeros((B, H), jnp.float32)
        outs = []
        for t in range(S):
            gates = x[:, t, :] @ p["w_ih"].T + h @ p["w_hh"].T + p["b"]
            i_g = jax.nn.sigmoid(gates[:, 0 * H:1 * H])
            f_g = jax.nn.sigmoid(gates[:, 1 * H:2 * H])
            g_g = jnp.tanh(gates[:, 2 * H:3 * H])
            o_g = jax.nn.sigmoid(gates[:, 3 * H:4 * H])
            c = f_g * c + i_g * g_g
            h = o_g * jnp.tanh(c)
            outs.append(h)
        x = jnp.stack(outs, axis=1)
    return x, h, c


if __name__ == "__main__":
    key = jax.random.PRNGKey(0)
    batch, seq, input_size, hidden_size, num_layers = 2, 8, 16, 32, 2

    k_in, k_params = jax.random.split(key)
    input_seq = jax.random.normal(k_in, (batch, seq, input_size),
                                  dtype=jnp.float32)

    model = MultiLayerLSTM(input_size, hidden_size, num_layers, key=k_params)

    hidden_seq, h, c = model(input_seq)
    jax.block_until_ready((hidden_seq, h, c))

    # Sanity check against a pure-f32 JAX reference (kernel uses bf16 MXU
    # inputs / bf16 inter-layer activations with f32 accumulation & carry,
    # hence the looser tolerance).
    ref_seq, ref_h, ref_c = _reference_forward(model, input_seq)
    assert hidden_seq.shape == (batch, seq, hidden_size)
    assert h.shape == (batch, hidden_size) and c.shape == (batch, hidden_size)
    assert jnp.allclose(hidden_seq, ref_seq, atol=3e-2, rtol=3e-2)
    assert jnp.allclose(h, ref_h, atol=3e-2, rtol=3e-2)
    assert jnp.allclose(c, ref_c, atol=3e-2, rtol=3e-2)

    print("KERNEL_OK")
</pallas_src>

<mosaic_0001>
module attributes {stable_mosaic.version = 11 : i64} {
  func.func @_lstm_layer_kernel(%arg0: i32, %arg1: i32, %arg2: memref<8x16x128xbf16, #tpu.memory_space<vmem>>, %arg3: memref<128x512xbf16, #tpu.memory_space<vmem>>, %arg4: memref<128x512xbf16, #tpu.memory_space<vmem>>, %arg5: memref<1x512xf32, #tpu.memory_space<vmem>>, %arg6: memref<16x128xf32, #tpu.memory_space<vmem>>, %arg7: memref<16x128xf32, #tpu.memory_space<vmem>>, %arg8: memref<8x16x128xbf16, #tpu.memory_space<vmem>>, %arg9: memref<16x128xf32, #tpu.memory_space<vmem>>, %arg10: memref<16x128xf32, #tpu.memory_space<vmem>>, %arg11: memref<16x128xf32, #tpu.memory_space<vmem>>, %arg12: memref<16x128xf32, #tpu.memory_space<vmem>>, %arg13: memref<128x512xf32, #tpu.memory_space<vmem>>) attributes {dimension_semantics = [#tpu.dimension_semantics<parallel>, #tpu.dimension_semantics<arbitrary>], iteration_bounds = array<i64: 1, 1>, scalar_prefetch = 0 : i64, scratch_operands = 3 : i64, tpu.core_type = #tpu.core_type<tc>, window_params = [{transform_indices = @transform_0, window_bounds = array<i64: 8, 16, 128>}, {pipeline_mode = #tpu.pipeline_mode<synchronous>, transform_indices = @transform_1, window_bounds = array<i64: 128, 512>}, {pipeline_mode = #tpu.pipeline_mode<synchronous>, transform_indices = @transform_2, window_bounds = array<i64: 128, 512>}, {pipeline_mode = #tpu.pipeline_mode<synchronous>, transform_indices = @transform_3, window_bounds = array<i64: 1, 512>}, {pipeline_mode = #tpu.pipeline_mode<synchronous>, transform_indices = @transform_4, window_bounds = array<i64: 16, 128>}, {pipeline_mode = #tpu.pipeline_mode<synchronous>, transform_indices = @transform_5, window_bounds = array<i64: 16, 128>}, {transform_indices = @transform_6, window_bounds = array<i64: 8, 16, 128>}, {transform_indices = @transform_7, window_bounds = array<i64: 16, 128>}, {transform_indices = @transform_8, window_bounds = array<i64: 16, 128>}]} {
    %c0_i32 = arith.constant 0 : i32
    %0 = arith.cmpi eq, %arg1, %c0_i32 : i32
    %1 = arith.extui %0 : i1 to i32
    %c0_i32_0 = arith.constant 0 : i32
    %2 = arith.cmpi ne, %1, %c0_i32_0 : i32
    scf.if %2 {
      %c0_87 = arith.constant 0 : index
      %c0_88 = arith.constant 0 : index
      %314 = vector.load %arg6[%c0_87, %c0_88] : memref<16x128xf32, #tpu.memory_space<vmem>>, vector<16x128xf32>
      %c0_89 = arith.constant 0 : index
      %c0_90 = arith.constant 0 : index
      %315 = vector.load %arg11[%c0_89, %c0_90] : memref<16x128xf32, #tpu.memory_space<vmem>>, vector<16x128xf32>
      tpu.vector_store %arg11[%c0_89, %c0_90], %314 {strides = array<i32>} : memref<16x128xf32, #tpu.memory_space<vmem>>, vector<16x128xf32>,
      %c0_91 = arith.constant 0 : index
      %c0_92 = arith.constant 0 : index
      %316 = vector.load %arg7[%c0_91, %c0_92] : memref<16x128xf32, #tpu.memory_space<vmem>>, vector<16x128xf32>
      %c0_93 = arith.constant 0 : index
      %c0_94 = arith.constant 0 : index
      %317 = vector.load %arg12[%c0_93, %c0_94] : memref<16x128xf32, #tpu.memory_space<vmem>>, vector<16x128xf32>
      tpu.vector_store %arg12[%c0_93, %c0_94], %316 {strides = array<i32>} : memref<16x128xf32, #tpu.memory_space<vmem>>, vector<16x128xf32>,
    } else {
    }
    %c0 = arith.constant 0 : index
    %c0_1 = arith.constant 0 : index
    %c0_2 = arith.constant 0 : index
    %3 = vector.load %arg2[%c0, %c0_1, %c0_2] : memref<8x16x128xbf16, #tpu.memory_space<vmem>>, vector<8x16x128xbf16>
    %4 = vector.shape_cast %3 : vector<8x16x128xbf16> to vector<128x128xbf16>
    %c0_3 = arith.constant 0 : index
    %c0_4 = arith.constant 0 : index
    %5 = vector.load %arg3[%c0_3, %c0_4] : memref<128x512xbf16, #tpu.memory_space<vmem>>, vector<128x512xbf16>
    %cst = arith.constant dense<0.000000e+00> : vector<128x512xf32>
    %6 = tpu.matmul %4, %5, %cst {dimension_numbers = #tpu.dot_dimension_numbers<[1], [0], [0], [1], [0, 0, 1, 1], [], []>} : vector<128x128xbf16>, vector<128x512xbf16>, vector<128x512xf32> -> vector<128x512xf32>
    %c0_5 = arith.constant 0 : index
    %c0_6 = arith.constant 0 : index
    %7 = vector.load %arg5[%c0_5, %c0_6] : memref<1x512xf32, #tpu.memory_space<vmem>>, vector<1x512xf32>
    %8 = vector.broadcast %7 : vector<1x512xf32> to vector<128x512xf32>
    %9 = arith.addf %6, %8 : vector<128x512xf32>
    %c0_7 = arith.constant 0 : index
    %c0_8 = arith.constant 0 : index
    %10 = vector.load %arg13[%c0_7, %c0_8] : memref<128x512xf32, #tpu.memory_space<vmem>>, vector<128x512xf32>
    tpu.vector_store %arg13[%c0_7, %c0_8], %9 {strides = array<i32>} : memref<128x512xf32, #tpu.memory_space<vmem>>, vector<128x512xf32>,
    %c0_9 = arith.constant 0 : index
    %c0_10 = arith.constant 0 : index
    %11 = vector.load %arg4[%c0_9, %c0_10] : memref<128x512xbf16, #tpu.memory_space<vmem>>, vector<128x512xbf16>
    %c0_11 = arith.constant 0 : index
    %c0_12 = arith.constant 0 : index
    %12 = vector.load %arg11[%c0_11, %c0_12] : memref<16x128xf32, #tpu.memory_space<vmem>>, vector<16x128xf32>
    %c0_13 = arith.constant 0 : index
    %c0_14 = arith.constant 0 : index
    %13 = vector.load %arg12[%c0_13, %c0_14] : memref<16x128xf32, #tpu.memory_space<vmem>>, vector<16x128xf32>
    %c0_i32_15 = arith.constant 0 : i32
    %c16_i32 = arith.constant 16 : i32
    %14 = arith.muli %c0_i32_15, %c16_i32 : i32
    %15 = tpu.assume_multiple %14, 16 : i32
    %16 = arith.index_cast %15 : i32 to index
    %c0_16 = arith.constant 0 : index
    %17 = vector.load %arg13[%16, %c0_16] : memref<128x512xf32, #tpu.memory_space<vmem>>, vector<16x512xf32>
    %18 = arith.truncf %12 : vector<16x128xf32> to vector<16x128xbf16>
    %cst_17 = arith.constant dense<0.000000e+00> : vector<16x512xf32>
    %19 = tpu.matmul %18, %11, %cst_17 {dimension_numbers = #tpu.dot_dimension_numbers<[1], [0], [0], [1], [0, 0, 1, 1], [], []>} : vector<16x128xbf16>, vector<128x512xbf16>, vector<16x512xf32> -> vector<16x512xf32>
    %20 = arith.addf %17, %19 : vector<16x512xf32>
    %21 = vector.extract_strided_slice %20 {offsets = [0, 0], sizes = [16, 128], strides = [1, 1]} : vector<16x512xf32> to vector<16x128xf32>
    %22 = arith.negf %21 : vector<16x128xf32>
    %23 = math.exp %22 : vector<16x128xf32>
    %cst_18 = arith.constant 1.000000e+00 : f32
    %24 = vector.broadcast %cst_18 : f32 to vector<16x128xf32>
    %25 = arith.addf %24, %23 : vector<16x128xf32>
    %26 = arith.divf %24, %25 : vector<16x128xf32>
    %27 = vector.extract_strided_slice %20 {offsets = [0, 128], sizes = [16, 128], strides = [1, 1]} : vector<16x512xf32> to vector<16x128xf32>
    %28 = arith.negf %27 : vector<16x128xf32>
    %29 = math.exp %28 : vector<16x128xf32>
    %cst_19 = arith.constant 1.000000e+00 : f32
    %30 = vector.broadcast %cst_19 : f32 to vector<16x128xf32>
    %31 = arith.addf %30, %29 : vector<16x128xf32>
    %32 = arith.divf %30, %31 : vector<16x128xf32>
    %33 = vector.extract_strided_slice %20 {offsets = [0, 256], sizes = [16, 128], strides = [1, 1]} : vector<16x512xf32> to vector<16x128xf32>
    %34 = math.tanh %33 : vector<16x128xf32>
    %35 = vector.extract_strided_slice %20 {offsets = [0, 384], sizes = [16, 128], strides = [1, 1]} : vector<16x512xf32> to vector<16x128xf32>
    %36 = arith.negf %35 : vector<16x128xf32>
    %37 = math.exp %36 : vector<16x128xf32>
    %cst_20 = arith.constant 1.000000e+00 : f32
    %38 = vector.broadcast %cst_20 : f32 to vector<16x128xf32>
    %39 = arith.addf %38, %37 : vector<16x128xf32>
    %40 = arith.divf %38, %39 : vector<16x128xf32>
    %41 = arith.mulf %32, %13 : vector<16x128xf32>
    %42 = arith.mulf %26, %34 : vector<16x128xf32>
    %43 = arith.addf %41, %42 : vector<16x128xf32>
    %44 = math.tanh %43 : vector<16x128xf32>
    %45 = arith.mulf %40, %44 : vector<16x128xf32>
    %46 = arith.truncf %45 : vector<16x128xf32> to vector<16x128xbf16>
    %47 = arith.index_cast %c0_i32_15 : i32 to index
    %c0_21 = arith.constant 0 : index
    %c0_22 = arith.constant 0 : index
    %48 = vector.load %arg8[%47, %c0_21, %c0_22] : memref<8x16x128xbf16, #tpu.memory_space<vmem>>, vector<1x16x128xbf16>
    %49 = vector.shape_cast %48 : vector<1x16x128xbf16> to vector<16x128xbf16>
    %50 = vector.shape_cast %46 : vector<16x128xbf16> to vector<1x16x128xbf16>
    tpu.vector_store %arg8[%47, %c0_21, %c0_22], %50 {strides = array<i32>} : memref<8x16x128xbf16, #tpu.memory_space<vmem>>, vector<1x16x128xbf16>,
    %c1_i32 = arith.constant 1 : i32
    %c16_i32_23 = arith.constant 16 : i32
    %51 = arith.muli %c1_i32, %c16_i32_23 : i32
    %52 = tpu.assume_multiple %51, 16 : i32
    %53 = arith.index_cast %52 : i32 to index
    %c0_24 = arith.constant 0 : index
    %54 = vector.load %arg13[%53, %c0_24] : memref<128x512xf32, #tpu.memory_space<vmem>>, vector<16x512xf32>
    %55 = arith.truncf %45 : vector<16x128xf32> to vector<16x128xbf16>
    %cst_25 = arith.constant dense<0.000000e+00> : vector<16x512xf32>
    %56 = tpu.matmul %55, %11, %cst_25 {dimension_numbers = #tpu.dot_dimension_numbers<[1], [0], [0], [1], [0, 0, 1, 1], [], []>} : vector<16x128xbf16>, vector<128x512xbf16>, vector<16x512xf32> -> vector<16x512xf32>
    %57 = arith.addf %54, %56 : vector<16x512xf32>
    %58 = vector.extract_strided_slice %57 {offsets = [0, 0], sizes = [16, 128], strides = [1, 1]} : vector<16x512xf32> to vector<16x128xf32>
    %59 = arith.negf %58 : vector<16x128xf32>
    %60 = math.exp %59 : vector<16x128xf32>
    %cst_26 = arith.constant 1.000000e+00 : f32
    %61 = vector.broadcast %cst_26 : f32 to vector<16x128xf32>
    %62 = arith.addf %61, %60 : vector<16x128xf32>
    %63 = arith.divf %61, %62 : vector<16x128xf32>
    %64 = vector.extract_strided_slice %57 {offsets = [0, 128], sizes = [16, 128], strides = [1, 1]} : vector<16x512xf32> to vector<16x128xf32>
    %65 = arith.negf %64 : vector<16x128xf32>
    %66 = math.exp %65 : vector<16x128xf32>
    %cst_27 = arith.constant 1.000000e+00 : f32
    %67 = vector.broadcast %cst_27 : f32 to vector<16x128xf32>
    %68 = arith.addf %67, %66 : vector<16x128xf32>
    %69 = arith.divf %67, %68 : vector<16x128xf32>
    %70 = vector.extract_strided_slice %57 {offsets = [0, 256], sizes = [16, 128], strides = [1, 1]} : vector<16x512xf32> to vector<16x128xf32>
    %71 = math.tanh %70 : vector<16x128xf32>
    %72 = vector.extract_strided_slice %57 {offsets = [0, 384], sizes = [16, 128], strides = [1, 1]} : vector<16x512xf32> to vector<16x128xf32>
    %73 = arith.negf %72 : vector<16x128xf32>
    %74 = math.exp %73 : vector<16x128xf32>
    %cst_28 = arith.constant 1.000000e+00 : f32
    %75 = vector.broadcast %cst_28 : f32 to vector<16x128xf32>
    %76 = arith.addf %75, %74 : vector<16x128xf32>
    %77 = arith.divf %75, %76 : vector<16x128xf32>
    %78 = arith.mulf %69, %43 : vector<16x128xf32>
    %79 = arith.mulf %63, %71 : vector<16x128xf32>
    %80 = arith.addf %78, %79 : vector<16x128xf32>
    %81 = math.tanh %80 : vector<16x128xf32>
    %82 = arith.mulf %77, %81 : vector<16x128xf32>
    %83 = arith.truncf %82 : vector<16x128xf32> to vector<16x128xbf16>
    %84 = arith.index_cast %c1_i32 : i32 to index
    %c0_29 = arith.constant 0 : index
    %c0_30 = arith.constant 0 : index
    %85 = vector.load %arg8[%84, %c0_29, %c0_30] : memref<8x16x128xbf16, #tpu.memory_space<vmem>>, vector<1x16x128xbf16>
    %86 = vector.shape_cast %85 : vector<1x16x128xbf16> to vector<16x128xbf16>
    %87 = vector.shape_cast %83 : vector<16x128xbf16> to vector<1x16x128xbf16>
    tpu.vector_store %arg8[%84, %c0_29, %c0_30], %87 {strides = array<i32>} : memref<8x16x128xbf16, #tpu.memory_space<vmem>>, vector<1x16x128xbf16>,
    %c2_i32 = arith.constant 2 : i32
    %c16_i32_31 = arith.constant 16 : i32
    %88 = arith.muli %c2_i32, %c16_i32_31 : i32
    %89 = tpu.assume_multiple %88, 16 : i32
    %90 = arith.index_cast %89 : i32 to index
    %c0_32 = arith.constant 0 : index
    %91 = vector.load %arg13[%90, %c0_32] : memref<128x512xf32, #tpu.memory_space<vmem>>, vector<16x512xf32>
    %92 = arith.truncf %82 : vector<16x128xf32> to vector<16x128xbf16>
    %cst_33 = arith.constant dense<0.000000e+00> : vector<16x512xf32>
    %93 = tpu.matmul %92, %11, %cst_33 {dimension_numbers = #tpu.dot_dimension_numbers<[1], [0], [0], [1], [0, 0, 1, 1], [], []>} : vector<16x128xbf16>, vector<128x512xbf16>, vector<16x512xf32> -> vector<16x512xf32>
    %94 = arith.addf %91, %93 : vector<16x512xf32>
    %95 = vector.extract_strided_slice %94 {offsets = [0, 0], sizes = [16, 128], strides = [1, 1]} : vector<16x512xf32> to vector<16x128xf32>
    %96 = arith.negf %95 : vector<16x128xf32>
    %97 = math.exp %96 : vector<16x128xf32>
    %cst_34 = arith.constant 1.000000e+00 : f32
    %98 = vector.broadcast %cst_34 : f32 to vector<16x128xf32>
    %99 = arith.addf %98, %97 : vector<16x128xf32>
    %100 = arith.divf %98, %99 : vector<16x128xf32>
    %101 = vector.extract_strided_slice %94 {offsets = [0, 128], sizes = [16, 128], strides = [1, 1]} : vector<16x512xf32> to vector<16x128xf32>
    %102 = arith.negf %101 : vector<16x128xf32>
    %103 = math.exp %102 : vector<16x128xf32>
    %cst_35 = arith.constant 1.000000e+00 : f32
    %104 = vector.broadcast %cst_35 : f32 to vector<16x128xf32>
    %105 = arith.addf %104, %103 : vector<16x128xf32>
    %106 = arith.divf %104, %105 : vector<16x128xf32>
    %107 = vector.extract_strided_slice %94 {offsets = [0, 256], sizes = [16, 128], strides = [1, 1]} : vector<16x512xf32> to vector<16x128xf32>
    %108 = math.tanh %107 : vector<16x128xf32>
    %109 = vector.extract_strided_slice %94 {offsets = [0, 384], sizes = [16, 128], strides = [1, 1]} : vector<16x512xf32> to vector<16x128xf32>
    %110 = arith.negf %109 : vector<16x128xf32>
    %111 = math.exp %110 : vector<16x128xf32>
    %cst_36 = arith.constant 1.000000e+00 : f32
    %112 = vector.broadcast %cst_36 : f32 to vector<16x128xf32>
    %113 = arith.addf %112, %111 : vector<16x128xf32>
    %114 = arith.divf %112, %113 : vector<16x128xf32>
    %115 = arith.mulf %106, %80 : vector<16x128xf32>
    %116 = arith.mulf %100, %108 : vector<16x128xf32>
    %117 = arith.addf %115, %116 : vector<16x128xf32>
    %118 = math.tanh %117 : vector<16x128xf32>
    %119 = arith.mulf %114, %118 : vector<16x128xf32>
    %120 = arith.truncf %119 : vector<16x128xf32> to vector<16x128xbf16>
    %121 = arith.index_cast %c2_i32 : i32 to index
    %c0_37 = arith.constant 0 : index
    %c0_38 = arith.constant 0 : index
    %122 = vector.load %arg8[%121, %c0_37, %c0_38] : memref<8x16x128xbf16, #tpu.memory_space<vmem>>, vector<1x16x128xbf16>
    %123 = vector.shape_cast %122 : vector<1x16x128xbf16> to vector<16x128xbf16>
    %124 = vector.shape_cast %120 : vector<16x128xbf16> to vector<1x16x128xbf16>
    tpu.vector_store %arg8[%121, %c0_37, %c0_38], %124 {strides = array<i32>} : memref<8x16x128xbf16, #tpu.memory_space<vmem>>, vector<1x16x128xbf16>,
    %c3_i32 = arith.constant 3 : i32
    %c16_i32_39 = arith.constant 16 : i32
    %125 = arith.muli %c3_i32, %c16_i32_39 : i32
    %126 = tpu.assume_multiple %125, 16 : i32
    %127 = arith.index_cast %126 : i32 to index
    %c0_40 = arith.constant 0 : index
    %128 = vector.load %arg13[%127, %c0_40] : memref<128x512xf32, #tpu.memory_space<vmem>>, vector<16x512xf32>
    %129 = arith.truncf %119 : vector<16x128xf32> to vector<16x128xbf16>
    %cst_41 = arith.constant dense<0.000000e+00> : vector<16x512xf32>
    %130 = tpu.matmul %129, %11, %cst_41 {dimension_numbers = #tpu.dot_dimension_numbers<[1], [0], [0], [1], [0, 0, 1, 1], [], []>} : vector<16x128xbf16>, vector<128x512xbf16>, vector<16x512xf32> -> vector<16x512xf32>
    %131 = arith.addf %128, %130 : vector<16x512xf32>
    %132 = vector.extract_strided_slice %131 {offsets = [0, 0], sizes = [16, 128], strides = [1, 1]} : vector<16x512xf32> to vector<16x128xf32>
    %133 = arith.negf %132 : vector<16x128xf32>
    %134 = math.exp %133 : vector<16x128xf32>
    %cst_42 = arith.constant 1.000000e+00 : f32
    %135 = vector.broadcast %cst_42 : f32 to vector<16x128xf32>
    %136 = arith.addf %135, %134 : vector<16x128xf32>
    %137 = arith.divf %135, %136 : vector<16x128xf32>
    %138 = vector.extract_strided_slice %131 {offsets = [0, 128], sizes = [16, 128], strides = [1, 1]} : vector<16x512xf32> to vector<16x128xf32>
    %139 = arith.negf %138 : vector<16x128xf32>
    %140 = math.exp %139 : vector<16x128xf32>
    %cst_43 = arith.constant 1.000000e+00 : f32
    %141 = vector.broadcast %cst_43 : f32 to vector<16x128xf32>
    %142 = arith.addf %141, %140 : vector<16x128xf32>
    %143 = arith.divf %141, %142 : vector<16x128xf32>
    %144 = vector.extract_strided_slice %131 {offsets = [0, 256], sizes = [16, 128], strides = [1, 1]} : vector<16x512xf32> to vector<16x128xf32>
    %145 = math.tanh %144 : vector<16x128xf32>
    %146 = vector.extract_strided_slice %131 {offsets = [0, 384], sizes = [16, 128], strides = [1, 1]} : vector<16x512xf32> to vector<16x128xf32>
    %147 = arith.negf %146 : vector<16x128xf32>
    %148 = math.exp %147 : vector<16x128xf32>
    %cst_44 = arith.constant 1.000000e+00 : f32
    %149 = vector.broadcast %cst_44 : f32 to vector<16x128xf32>
    %150 = arith.addf %149, %148 : vector<16x128xf32>
    %151 = arith.divf %149, %150 : vector<16x128xf32>
    %152 = arith.mulf %143, %117 : vector<16x128xf32>
    %153 = arith.mulf %137, %145 : vector<16x128xf32>
    %154 = arith.addf %152, %153 : vector<16x128xf32>
    %155 = math.tanh %154 : vector<16x128xf32>
    %156 = arith.mulf %151, %155 : vector<16x128xf32>
    %157 = arith.truncf %156 : vector<16x128xf32> to vector<16x128xbf16>
    %158 = arith.index_cast %c3_i32 : i32 to index
    %c0_45 = arith.constant 0 : index
    %c0_46 = arith.constant 0 : index
    %159 = vector.load %arg8[%158, %c0_45, %c0_46] : memref<8x16x128xbf16, #tpu.memory_space<vmem>>, vector<1x16x128xbf16>
    %160 = vector.shape_cast %159 : vector<1x16x128xbf16> to vector<16x128xbf16>
    %161 = vector.shape_cast %157 : vector<16x128xbf16> to vector<1x16x128xbf16>
    tpu.vector_store %arg8[%158, %c0_45, %c0_46], %161 {strides = array<i32>} : memref<8x16x128xbf16, #tpu.memory_space<vmem>>, vector<1x16x128xbf16>,
    %c4_i32 = arith.constant 4 : i32
    %c16_i32_47 = arith.constant 16 : i32
    %162 = arith.muli %c4_i32, %c16_i32_47 : i32
    %163 = tpu.assume_multiple %162, 16 : i32
    %164 = arith.index_cast %163 : i32 to index
    %c0_48 = arith.constant 0 : index
    %165 = vector.load %arg13[%164, %c0_48] : memref<128x512xf32, #tpu.memory_space<vmem>>, vector<16x512xf32>
    %166 = arith.truncf %156 : vector<16x128xf32> to vector<16x128xbf16>
    %cst_49 = arith.constant dense<0.000000e+00> : vector<16x512xf32>
    %167 = tpu.matmul %166, %11, %cst_49 {dimension_numbers = #tpu.dot_dimension_numbers<[1], [0], [0], [1], [0, 0, 1, 1], [], []>} : vector<16x128xbf16>, vector<128x512xbf16>, vector<16x512xf32> -> vector<16x512xf32>
    %168 = arith.addf %165, %167 : vector<16x512xf32>
    %169 = vector.extract_strided_slice %168 {offsets = [0, 0], sizes = [16, 128], strides = [1, 1]} : vector<16x512xf32> to vector<16x128xf32>
    %170 = arith.negf %169 : vector<16x128xf32>
    %171 = math.exp %170 : vector<16x128xf32>
    %cst_50 = arith.constant 1.000000e+00 : f32
    %172 = vector.broadcast %cst_50 : f32 to vector<16x128xf32>
    %173 = arith.addf %172, %171 : vector<16x128xf32>
    %174 = arith.divf %172, %173 : vector<16x128xf32>
    %175 = vector.extract_strided_slice %168 {offsets = [0, 128], sizes = [16, 128], strides = [1, 1]} : vector<16x512xf32> to vector<16x128xf32>
    %176 = arith.negf %175 : vector<16x128xf32>
    %177 = math.exp %176 : vector<16x128xf32>
    %cst_51 = arith.constant 1.000000e+00 : f32
    %178 = vector.broadcast %cst_51 : f32 to vector<16x128xf32>
    %179 = arith.addf %178, %177 : vector<16x128xf32>
    %180 = arith.divf %178, %179 : vector<16x128xf32>
    %181 = vector.extract_strided_slice %168 {offsets = [0, 256], sizes = [16, 128], strides = [1, 1]} : vector<16x512xf32> to vector<16x128xf32>
    %182 = math.tanh %181 : vector<16x128xf32>
    %183 = vector.extract_strided_slice %168 {offsets = [0, 384], sizes = [16, 128], strides = [1, 1]} : vector<16x512xf32> to vector<16x128xf32>
    %184 = arith.negf %183 : vector<16x128xf32>
    %185 = math.exp %184 : vector<16x128xf32>
    %cst_52 = arith.constant 1.000000e+00 : f32
    %186 = vector.broadcast %cst_52 : f32 to vector<16x128xf32>
    %187 = arith.addf %186, %185 : vector<16x128xf32>
    %188 = arith.divf %186, %187 : vector<16x128xf32>
    %189 = arith.mulf %180, %154 : vector<16x128xf32>
    %190 = arith.mulf %174, %182 : vector<16x128xf32>
    %191 = arith.addf %189, %190 : vector<16x128xf32>
    %192 = math.tanh %191 : vector<16x128xf32>
    %193 = arith.mulf %188, %192 : vector<16x128xf32>
    %194 = arith.truncf %193 : vector<16x128xf32> to vector<16x128xbf16>
    %195 = arith.index_cast %c4_i32 : i32 to index
    %c0_53 = arith.constant 0 : index
    %c0_54 = arith.constant 0 : index
    %196 = vector.load %arg8[%195, %c0_53, %c0_54] : memref<8x16x128xbf16, #tpu.memory_space<vmem>>, vector<1x16x128xbf16>
    %197 = vector.shape_cast %196 : vector<1x16x128xbf16> to vector<16x128xbf16>
    %198 = vector.shape_cast %194 : vector<16x128xbf16> to vector<1x16x128xbf16>
    tpu.vector_store %arg8[%195, %c0_53, %c0_54], %198 {strides = array<i32>} : memref<8x16x128xbf16, #tpu.memory_space<vmem>>, vector<1x16x128xbf16>,
    %c5_i32 = arith.constant 5 : i32
    %c16_i32_55 = arith.constant 16 : i32
    %199 = arith.muli %c5_i32, %c16_i32_55 : i32
    %200 = tpu.assume_multiple %199, 16 : i32
    %201 = arith.index_cast %200 : i32 to index
    %c0_56 = arith.constant 0 : index
    %202 = vector.load %arg13[%201, %c0_56] : memref<128x512xf32, #tpu.memory_space<vmem>>, vector<16x512xf32>
    %203 = arith.truncf %193 : vector<16x128xf32> to vector<16x128xbf16>
    %cst_57 = arith.constant dense<0.000000e+00> : vector<16x512xf32>
    %204 = tpu.matmul %203, %11, %cst_57 {dimension_numbers = #tpu.dot_dimension_numbers<[1], [0], [0], [1], [0, 0, 1, 1], [], []>} : vector<16x128xbf16>, vector<128x512xbf16>, vector<16x512xf32> -> vector<16x512xf32>
    %205 = arith.addf %202, %204 : vector<16x512xf32>
    %206 = vector.extract_strided_slice %205 {offsets = [0, 0], sizes = [16, 128], strides = [1, 1]} : vector<16x512xf32> to vector<16x128xf32>
    %207 = arith.negf %206 : vector<16x128xf32>
    %208 = math.exp %207 : vector<16x128xf32>
    %cst_58 = arith.constant 1.000000e+00 : f32
    %209 = vector.broadcast %cst_58 : f32 to vector<16x128xf32>
    %210 = arith.addf %209, %208 : vector<16x128xf32>
    %211 = arith.divf %209, %210 : vector<16x128xf32>
    %212 = vector.extract_strided_slice %205 {offsets = [0, 128], sizes = [16, 128], strides = [1, 1]} : vector<16x512xf32> to vector<16x128xf32>
    %213 = arith.negf %212 : vector<16x128xf32>
    %214 = math.exp %213 : vector<16x128xf32>
    %cst_59 = arith.constant 1.000000e+00 : f32
    %215 = vector.broadcast %cst_59 : f32 to vector<16x128xf32>
    %216 = arith.addf %215, %214 : vector<16x128xf32>
    %217 = arith.divf %215, %216 : vector<16x128xf32>
    %218 = vector.extract_strided_slice %205 {offsets = [0, 256], sizes = [16, 128], strides = [1, 1]} : vector<16x512xf32> to vector<16x128xf32>
    %219 = math.tanh %218 : vector<16x128xf32>
    %220 = vector.extract_strided_slice %205 {offsets = [0, 384], sizes = [16, 128], strides = [1, 1]} : vector<16x512xf32> to vector<16x128xf32>
    %221 = arith.negf %220 : vector<16x128xf32>
    %222 = math.exp %221 : vector<16x128xf32>
    %cst_60 = arith.constant 1.000000e+00 : f32
    %223 = vector.broadcast %cst_60 : f32 to vector<16x128xf32>
    %224 = arith.addf %223, %222 : vector<16x128xf32>
    %225 = arith.divf %223, %224 : vector<16x128xf32>
    %226 = arith.mulf %217, %191 : vector<16x128xf32>
    %227 = arith.mulf %211, %219 : vector<16x128xf32>
    %228 = arith.addf %226, %227 : vector<16x128xf32>
    %229 = math.tanh %228 : vector<16x128xf32>
    %230 = arith.mulf %225, %229 : vector<16x128xf32>
    %231 = arith.truncf %230 : vector<16x128xf32> to vector<16x128xbf16>
    %232 = arith.index_cast %c5_i32 : i32 to index
    %c0_61 = arith.constant 0 : index
    %c0_62 = arith.constant 0 : index
    %233 = vector.load %arg8[%232, %c0_61, %c0_62] : memref<8x16x128xbf16, #tpu.memory_space<vmem>>, vector<1x16x128xbf16>
    %234 = vector.shape_cast %233 : vector<1x16x128xbf16> to vector<16x128xbf16>
    %235 = vector.shape_cast %231 : vector<16x128xbf16> to vector<1x16x128xbf16>
    tpu.vector_store %arg8[%232, %c0_61, %c0_62], %235 {strides = array<i32>} : memref<8x16x128xbf16, #tpu.memory_space<vmem>>, vector<1x16x128xbf16>,
    %c6_i32 = arith.constant 6 : i32
    %c16_i32_63 = arith.constant 16 : i32
    %236 = arith.muli %c6_i32, %c16_i32_63 : i32
    %237 = tpu.assume_multiple %236, 16 : i32
    %238 = arith.index_cast %237 : i32 to index
    %c0_64 = arith.constant 0 : index
    %239 = vector.load %arg13[%238, %c0_64] : memref<128x512xf32, #tpu.memory_space<vmem>>, vector<16x512xf32>
    %240 = arith.truncf %230 : vector<16x128xf32> to vector<16x128xbf16>
    %cst_65 = arith.constant dense<0.000000e+00> : vector<16x512xf32>
    %241 = tpu.matmul %240, %11, %cst_65 {dimension_numbers = #tpu.dot_dimension_numbers<[1], [0], [0], [1], [0, 0, 1, 1], [], []>} : vector<16x128xbf16>, vector<128x512xbf16>, vector<16x512xf32> -> vector<16x512xf32>
    %242 = arith.addf %239, %241 : vector<16x512xf32>
    %243 = vector.extract_strided_slice %242 {offsets = [0, 0], sizes = [16, 128], strides = [1, 1]} : vector<16x512xf32> to vector<16x128xf32>
    %244 = arith.negf %243 : vector<16x128xf32>
    %245 = math.exp %244 : vector<16x128xf32>
    %cst_66 = arith.constant 1.000000e+00 : f32
    %246 = vector.broadcast %cst_66 : f32 to vector<16x128xf32>
    %247 = arith.addf %246, %245 : vector<16x128xf32>
    %248 = arith.divf %246, %247 : vector<16x128xf32>
    %249 = vector.extract_strided_slice %242 {offsets = [0, 128], sizes = [16, 128], strides = [1, 1]} : vector<16x512xf32> to vector<16x128xf32>
    %250 = arith.negf %249 : vector<16x128xf32>
    %251 = math.exp %250 : vector<16x128xf32>
    %cst_67 = arith.constant 1.000000e+00 : f32
    %252 = vector.broadcast %cst_67 : f32 to vector<16x128xf32>
    %253 = arith.addf %252, %251 : vector<16x128xf32>
    %254 = arith.divf %252, %253 : vector<16x128xf32>
    %255 = vector.extract_strided_slice %242 {offsets = [0, 256], sizes = [16, 128], strides = [1, 1]} : vector<16x512xf32> to vector<16x128xf32>
    %256 = math.tanh %255 : vector<16x128xf32>
    %257 = vector.extract_strided_slice %242 {offsets = [0, 384], sizes = [16, 128], strides = [1, 1]} : vector<16x512xf32> to vector<16x128xf32>
    %258 = arith.negf %257 : vector<16x128xf32>
    %259 = math.exp %258 : vector<16x128xf32>
    %cst_68 = arith.constant 1.000000e+00 : f32
    %260 = vector.broadcast %cst_68 : f32 to vector<16x128xf32>
    %261 = arith.addf %260, %259 : vector<16x128xf32>
    %262 = arith.divf %260, %261 : vector<16x128xf32>
    %263 = arith.mulf %254, %228 : vector<16x128xf32>
    %264 = arith.mulf %248, %256 : vector<16x128xf32>
    %265 = arith.addf %263, %264 : vector<16x128xf32>
    %266 = math.tanh %265 : vector<16x128xf32>
    %267 = arith.mulf %262, %266 : vector<16x128xf32>
    %268 = arith.truncf %267 : vector<16x128xf32> to vector<16x128xbf16>
    %269 = arith.index_cast %c6_i32 : i32 to index
    %c0_69 = arith.constant 0 : index
    %c0_70 = arith.constant 0 : index
    %270 = vector.load %arg8[%269, %c0_69, %c0_70] : memref<8x16x128xbf16, #tpu.memory_space<vmem>>, vector<1x16x128xbf16>
    %271 = vector.shape_cast %270 : vector<1x16x128xbf16> to vector<16x128xbf16>
    %272 = vector.shape_cast %268 : vector<16x128xbf16> to vector<1x16x128xbf16>
    tpu.vector_store %arg8[%269, %c0_69, %c0_70], %272 {strides = array<i32>} : memref<8x16x128xbf16, #tpu.memory_space<vmem>>, vector<1x16x128xbf16>,
    %c7_i32 = arith.constant 7 : i32
    %c16_i32_71 = arith.constant 16 : i32
    %273 = arith.muli %c7_i32, %c16_i32_71 : i32
    %274 = tpu.assume_multiple %273, 16 : i32
    %275 = arith.index_cast %274 : i32 to index
    %c0_72 = arith.constant 0 : index
    %276 = vector.load %arg13[%275, %c0_72] : memref<128x512xf32, #tpu.memory_space<vmem>>, vector<16x512xf32>
    %277 = arith.truncf %267 : vector<16x128xf32> to vector<16x128xbf16>
    %cst_73 = arith.constant dense<0.000000e+00> : vector<16x512xf32>
    %278 = tpu.matmul %277, %11, %cst_73 {dimension_numbers = #tpu.dot_dimension_numbers<[1], [0], [0], [1], [0, 0, 1, 1], [], []>} : vector<16x128xbf16>, vector<128x512xbf16>, vector<16x512xf32> -> vector<16x512xf32>
    %279 = arith.addf %276, %278 : vector<16x512xf32>
    %280 = vector.extract_strided_slice %279 {offsets = [0, 0], sizes = [16, 128], strides = [1, 1]} : vector<16x512xf32> to vector<16x128xf32>
    %281 = arith.negf %280 : vector<16x128xf32>
    %282 = math.exp %281 : vector<16x128xf32>
    %cst_74 = arith.constant 1.000000e+00 : f32
    %283 = vector.broadcast %cst_74 : f32 to vector<16x128xf32>
    %284 = arith.addf %283, %282 : vector<16x128xf32>
    %285 = arith.divf %283, %284 : vector<16x128xf32>
    %286 = vector.extract_strided_slice %279 {offsets = [0, 128], sizes = [16, 128], strides = [1, 1]} : vector<16x512xf32> to vector<16x128xf32>
    %287 = arith.negf %286 : vector<16x128xf32>
    %288 = math.exp %287 : vector<16x128xf32>
    %cst_75 = arith.constant 1.000000e+00 : f32
    %289 = vector.broadcast %cst_75 : f32 to vector<16x128xf32>
    %290 = arith.addf %289, %288 : vector<16x128xf32>
    %291 = arith.divf %289, %290 : vector<16x128xf32>
    %292 = vector.extract_strided_slice %279 {offsets = [0, 256], sizes = [16, 128], strides = [1, 1]} : vector<16x512xf32> to vector<16x128xf32>
    %293 = math.tanh %292 : vector<16x128xf32>
    %294 = vector.extract_strided_slice %279 {offsets = [0, 384], sizes = [16, 128], strides = [1, 1]} : vector<16x512xf32> to vector<16x128xf32>
    %295 = arith.negf %294 : vector<16x128xf32>
    %296 = math.exp %295 : vector<16x128xf32>
    %cst_76 = arith.constant 1.000000e+00 : f32
    %297 = vector.broadcast %cst_76 : f32 to vector<16x128xf32>
    %298 = arith.addf %297, %296 : vector<16x128xf32>
    %299 = arith.divf %297, %298 : vector<16x128xf32>
    %300 = arith.mulf %291, %265 : vector<16x128xf32>
    %301 = arith.mulf %285, %293 : vector<16x128xf32>
    %302 = arith.addf %300, %301 : vector<16x128xf32>
    %303 = math.tanh %302 : vector<16x128xf32>
    %304 = arith.mulf %299, %303 : vector<16x128xf32>
    %305 = arith.truncf %304 : vector<16x128xf32> to vector<16x128xbf16>
    %306 = arith.index_cast %c7_i32 : i32 to index
    %c0_77 = arith.constant 0 : index
    %c0_78 = arith.constant 0 : index
    %307 = vector.load %arg8[%306, %c0_77, %c0_78] : memref<8x16x128xbf16, #tpu.memory_space<vmem>>, vector<1x16x128xbf16>
    %308 = vector.shape_cast %307 : vector<1x16x128xbf16> to vector<16x128xbf16>
    %309 = vector.shape_cast %305 : vector<16x128xbf16> to vector<1x16x128xbf16>
    tpu.vector_store %arg8[%306, %c0_77, %c0_78], %309 {strides = array<i32>} : memref<8x16x128xbf16, #tpu.memory_space<vmem>>, vector<1x16x128xbf16>,
    %c8_i32 = arith.constant 8 : i32
    %c0_79 = arith.constant 0 : index
    %c0_80 = arith.constant 0 : index
    %310 = vector.load %arg11[%c0_79, %c0_80] : memref<16x128xf32, #tpu.memory_space<vmem>>, vector<16x128xf32>
    tpu.vector_store %arg11[%c0_79, %c0_80], %304 {strides = array<i32>} : memref<16x128xf32, #tpu.memory_space<vmem>>, vector<16x128xf32>,
    %c0_81 = arith.constant 0 : index
    %c0_82 = arith.constant 0 : index
    %311 = vector.load %arg12[%c0_81, %c0_82] : memref<16x128xf32, #tpu.memory_space<vmem>>, vector<16x128xf32>
    tpu.vector_store %arg12[%c0_81, %c0_82], %302 {strides = array<i32>} : memref<16x128xf32, #tpu.memory_space<vmem>>, vector<16x128xf32>,
    %c0_83 = arith.constant 0 : index
    %c0_84 = arith.constant 0 : index
    %312 = vector.load %arg9[%c0_83, %c0_84] : memref<16x128xf32, #tpu.memory_space<vmem>>, vector<16x128xf32>
    tpu.vector_store %arg9[%c0_83, %c0_84], %304 {strides = array<i32>} : memref<16x128xf32, #tpu.memory_space<vmem>>, vector<16x128xf32>,
    %c0_85 = arith.constant 0 : index
    %c0_86 = arith.constant 0 : index
    %313 = vector.load %arg10[%c0_85, %c0_86] : memref<16x128xf32, #tpu.memory_space<vmem>>, vector<16x128xf32>
    tpu.vector_store %arg10[%c0_85, %c0_86], %302 {strides = array<i32>} : memref<16x128xf32, #tpu.memory_space<vmem>>, vector<16x128xf32>,
    return
  }
  func.func @transform_0(%arg0: i32, %arg1: i32) -> (i32, i32, i32) {
    %c0_i32 = arith.constant 0 : i32
    %c0_i32_0 = arith.constant 0 : i32
    return %arg1, %arg0, %c0_i32 : i32, i32, i32
  }
  func.func @transform_1(%arg0: i32, %arg1: i32) -> (i32, i32) {
    %c0_i32 = arith.constant 0 : i32
    %c0_i32_0 = arith.constant 0 : i32
    %c0_i32_1 = arith.constant 0 : i32
    return %c0_i32, %c0_i32_0 : i32, i32
  }
  func.func @transform_2(%arg0: i32, %arg1: i32) -> (i32, i32) {
    %c0_i32 = arith.constant 0 : i32
    %c0_i32_0 = arith.constant 0 : i32
    %c0_i32_1 = arith.constant 0 : i32
    return %c0_i32, %c0_i32_0 : i32, i32
  }
  func.func @transform_3(%arg0: i32, %arg1: i32) -> (i32, i32) {
    %c0_i32 = arith.constant 0 : i32
    %c0_i32_0 = arith.constant 0 : i32
    %c0_i32_1 = arith.constant 0 : i32
    return %c0_i32, %c0_i32_0 : i32, i32
  }
  func.func @transform_4(%arg0: i32, %arg1: i32) -> (i32, i32) {
    %c0_i32 = arith.constant 0 : i32
    %c0_i32_0 = arith.constant 0 : i32
    return %arg0, %c0_i32 : i32, i32
  }
  func.func @transform_5(%arg0: i32, %arg1: i32) -> (i32, i32) {
    %c0_i32 = arith.constant 0 : i32
    %c0_i32_0 = arith.constant 0 : i32
    return %arg0, %c0_i32 : i32, i32
  }
  func.func @transform_6(%arg0: i32, %arg1: i32) -> (i32, i32, i32) {
    %c0_i32 = arith.constant 0 : i32
    %c0_i32_0 = arith.constant 0 : i32
    return %arg1, %arg0, %c0_i32 : i32, i32, i32
  }
  func.func @transform_7(%arg0: i32, %arg1: i32) -> (i32, i32) {
    %c0_i32 = arith.constant 0 : i32
    %c0_i32_0 = arith.constant 0 : i32
    return %arg0, %c0_i32 : i32, i32
  }
  func.func @transform_8(%arg0: i32, %arg1: i32) -> (i32, i32) {
    %c0_i32 = arith.constant 0 : i32
    %c0_i32_0 = arith.constant 0 : i32
    return %arg0, %c0_i32 : i32, i32
  }
}

</mosaic_0001>

<bundles_post_ra>
// kernel: tpu_custom_call.1
= control target key start
LH: loop header
LB: loop body
LE: loop exit
PB: predicated region body
PF: predicated region fallthrough
CT: control target
= control target key end

     0   :  { %14 = vsyncpa [#allocation6], 0  ;;  %s3866_s0 = inlined_call_operand.hbm [shape: bf16[8,16,128], index: 0, kind: input, shape index: {}]   ;;  %s3867_s1 = inlined_call_operand.hbm [shape: bf16[128,512], index: 1, kind: input, shape index: {}]   ;;  %s3868_s2 = inlined_call_operand.hbm [shape: bf16[128,512], index: 2, kind: input, shape index: {}]   ;;  %s3869_s3 = inlined_call_operand.vmem [shape: f32[1,512], index: 3, kind: input, shape index: {}]   ;;  %s3870_s4 = inlined_call_operand.hbm [shape: f32[16,128], index: 4, kind: input, shape index: {}]   ;;  %s3871_s5 = inlined_call_operand.hbm [shape: f32[16,128], index: 5, kind: input, shape index: {}]   ;;  %s3872_s6 = inlined_call_operand.hbm [shape: bf16[8,16,128], index: 6, kind: output, shape index: {0}]   ;;  %s3873_s7 = inlined_call_operand.hbm [shape: f32[16,128], index: 7, kind: output, shape index: {1}]   ;;  %s3874_s8 = inlined_call_operand.hbm [shape: f32[16,128], index: 8, kind: output, shape index: {2}]  }
   0x1   :  { %15 = vsyncpa [#allocation9], 0 }
   0x2   :  { %16 = vsyncpa [#allocation12], 0 }
   0x3   :  { %17 = vsyncpa [#allocation7], 0 }
   0x4   :  { %18 = vsyncpa [#allocation16], 0  ;;  %s3019_s27 = smov [#allocation8]  }
   0x5   :  { %s36_s28 = sshll.u32 %s3019_s27, 4  ;;  %s37_s28 = int_to_ptr.vmem [resolvable:$true] %s36_s28 }
   0x6   :  { %s2857_s29 = scalar_lea.vmem %s37_s28, 4096  ;;  %p2862_p1 = scmp.lt.s32.totalorder %s37_s28, %s37_s28 }
   0x7   :  { %p2858_p0 = scmp.ne.s32.totalorder %s37_s28, %s2857_s29  ;;  %p2863_p2 = scmp.lt.s32.totalorder %s2857_s29, %s2857_s29 }
   0x9   :  { %p2864_p3 = por %p2863_p2, %p2862_p1 }
   0xb   :  { %p2865_p4 = pnand %p2864_p3, %p2858_p0 }
   0xd   :  { %2868 = shalt.err (!%p2865_p4)
}
   0xe   :  { %s3020_s30 = smov 256   ;;  %s3021_s9 = smov 16  }
   0xf   :  { %42 = dma.hbm_to_vmem [thread:$0]  %s3867_s1, 4096, %s37_s28, [#allocation9], %s3020_s30, %s3020_s30, %s3021_s9  }
  0x10   :  { %s3022_s12 = smov [#allocation11]  }
  0x11   :  { %s62_s13 = sshll.u32 %s3022_s12, 4  ;;  %s63_s13 = int_to_ptr.vmem [resolvable:$true] %s62_s13 }
  0x12   :  { %s2877_s14 = scalar_lea.vmem %s63_s13, 256  ;;  %p2882_p6 = scmp.lt.s32.totalorder %s63_s13, %s63_s13 }
  0x13   :  { %p2878_p5 = scmp.ne.s32.totalorder %s63_s13, %s2877_s14  ;;  %p2883_p7 = scmp.lt.s32.totalorder %s2877_s14, %s2877_s14 }
  0x15   :  { %p2884_p8 = por %p2883_p7, %p2882_p6 }
  0x17   :  { %p2885_p9 = pnand %p2884_p8, %p2878_p5 }
  0x19   :  { %2888 = shalt.err (!%p2885_p9)
}
  0x1a   :  { %s3023_s15 = smov 128   ;;  %s3024_s16 = smov 8  }
  0x1b   :  { %68 = dma.hbm_to_vmem [thread:$0]  %s3870_s4, 256, %s63_s13, [#allocation12], %s3023_s15, %s3023_s15, %s3024_s16  }
  0x1c   :  { %s3025_s1 = smov [#allocation5]  }
  0x1d   :  { %s24_s19 = sshll.u32 %s3025_s1, 4  ;;  %s25_s19 = int_to_ptr.vmem [resolvable:$true] %s24_s19 }
  0x1e   :  { %s2897_s20 = scalar_lea.vmem %s25_s19, 1024  ;;  %p2902_p11 = scmp.lt.s32.totalorder %s25_s19, %s25_s19 }
  0x1f   :  { %p2898_p10 = scmp.ne.s32.totalorder %s25_s19, %s2897_s20  ;;  %p2903_p12 = scmp.lt.s32.totalorder %s2897_s20, %s2897_s20 }
  0x21   :  { %p2904_p13 = por %p2903_p12, %p2902_p11 }
  0x23   :  { %p2905_p0 = pnand %p2904_p13, %p2898_p10 }
  0x25   :  { %2908 = shalt.err (!%p2905_p0)
}
  0x26   :  { %s3026_s21 = smov 64   ;;  %s3027_s22 = smov 4  }
  0x27   :  { %30 = dma.hbm_to_vmem [thread:$0]  %s3866_s0, 1024, %s25_s19, [#allocation6], %s3026_s21, %s3026_s21, %s3027_s22  }
  0x28   :  { %s3028_s4 = smov [#allocation10]   ;;  %s3029_s26 = smov [#allocation13]  }
  0x29   :  { %s48_s25 = sshll.u32 %s3028_s4, 4  ;;  %s74_s27 = sshll.u32 %s3029_s26, 4  ;;  %s49_s25 = int_to_ptr.vmem [resolvable:$true] %s48_s25  ;;  %s75_s27 = int_to_ptr.vmem [resolvable:$true] %s74_s27 }
  0x2a   :  { %s2917_s28 = scalar_lea.vmem %s49_s25, 4096  ;;  %p2922_p2 = scmp.lt.s32.totalorder %s49_s25, %s49_s25 }
  0x2b   :  { %p2918_p1 = scmp.ne.s32.totalorder %s49_s25, %s2917_s28  ;;  %p2923_p3 = scmp.lt.s32.totalorder %s2917_s28, %s2917_s28 }
  0x2d   :  { %p2924_p4 = por %p2923_p3, %p2922_p2 }
  0x2f   :  { %p2925_p5 = pnand %p2924_p4, %p2918_p1 }
  0x31   :  { %2928 = shalt.err (!%p2925_p5)
}
  0x32   :  { %54 = dma.hbm_to_vmem [thread:$0]  %s3868_s2, 4096, %s49_s25, [#allocation9], %s3020_s30, %s3020_s30, %s3021_s9  }
  0x33   :  { %s2937_s0 = scalar_lea.vmem %s75_s27, 256  ;;  %p2942_p7 = scmp.lt.s32.totalorder %s75_s27, %s75_s27 }
  0x34   :  { %p2938_p6 = scmp.ne.s32.totalorder %s75_s27, %s2937_s0  ;;  %p2943_p8 = scmp.lt.s32.totalorder %s2937_s0, %s2937_s0 }
  0x36   :  { %p2944_p9 = por %p2943_p8, %p2942_p7 }
  0x38   :  { %p2945_p10 = pnand %p2944_p9, %p2938_p6 }
  0x3a   :  { %2948 = shalt.err (!%p2945_p10)
}
  0x3b   :  { %80 = dma.hbm_to_vmem [thread:$0]  %s3871_s5, 256, %s75_s27, [#allocation12], %s3023_s15, %s3023_s15, %s3024_s16  }
  0x3c   :  { %3009 = dma.done.wait [#allocation6], 1024  }
  0x3d   :  { %3010 = vsyncadd [#allocation6], 4294966272 }
  0x3e   :  { %3011 = dma.done.wait [#allocation9], 8192  }
  0x3f   :  { %3012 = vsyncadd [#allocation9], 4294959104 }
  0x40   :  { %3013 = dma.done.wait [#allocation12], 512  }
  0x41   :  { %3014 = vsyncadd [#allocation12], 4294966784  ;;  %v3875_v0 = vmov 0   ;;  %v2457_v1 = vld [vmem:[#allocation8 + $0xe4] ss:$16 sps:$4 sm:$0xff]   ;;  %v2509_v43 = vld [vmem:[#allocation5 + $0x8] sm:$0xff]  }
  0x42   :  { %419 = vmatprep.mubr.bf16.mxu0 %v3875_v0  ;;  %532 = vmatprep.mubr.bf16.mxu1 %v3875_v0  ;;  %v2459_v2 = vld [vmem:[#allocation8 + $0xec] ss:$16 sps:$4 sm:$0xff]   ;;  %v2461_v3 = vld [vmem:[#allocation8 + $0xe0] ss:$16 sps:$4 sm:$0xff]   ;;  %v2462_v4 = vld [vmem:[#allocation8 + $0xe8] ss:$16 sps:$4 sm:$0xff]  }
  0x43   :  { %387 = vmatprep.subr.bf16.mxu0 %v2457_v1  ;;  %500 = vmatprep.subr.bf16.mxu1 %v2459_v2  ;;  %v2463_v5 = vld [vmem:[#allocation8 + $0xc4] ss:$16 sps:$4 sm:$0xff]   ;;  %v2465_v6 = vld [vmem:[#allocation8 + $0xcc] ss:$16 sps:$4 sm:$0xff]   ;;  %v2467_v7 = vld [vmem:[#allocation8 + $0xc0] ss:$16 sps:$4 sm:$0xff]  }
  0x44   :  { %388 = vmatpush1.bf16.msra.mxu0 %v2461_v3  ;;  %501 = vmatpush1.bf16.msra.mxu1 %v2462_v4  ;;  %v2468_v8 = vld [vmem:[#allocation8 + $0xc8] ss:$16 sps:$4 sm:$0xff]   ;;  %v2469_v9 = vld [vmem:[#allocation8 + $0xa4] ss:$16 sps:$4 sm:$0xff]   ;;  %v2471_v10 = vld [vmem:[#allocation8 + $0xac] ss:$16 sps:$4 sm:$0xff]  }
  0x45   :  { %389 = vmatprep.subr.bf16.mxu0 %v2463_v5  ;;  %502 = vmatprep.subr.bf16.mxu1 %v2465_v6  ;;  %v2473_v11 = vld [vmem:[#allocation8 + $0xa0] ss:$16 sps:$4 sm:$0xff]   ;;  %v2474_v12 = vld [vmem:[#allocation8 + $0xa8] ss:$16 sps:$4 sm:$0xff]   ;;  %v2475_v13 = vld [vmem:[#allocation8 + $0x84] ss:$16 sps:$4 sm:$0xff]  }
  0x46   :  { %v2477_v14 = vld [vmem:[#allocation8 + $0x8c] ss:$16 sps:$4 sm:$0xff]   ;;  %v2479_v15 = vld [vmem:[#allocation8 + $0x80] ss:$16 sps:$4 sm:$0xff]   ;;  %v2480_v16 = vld [vmem:[#allocation8 + $0x88] ss:$16 sps:$4 sm:$0xff]  }
  0x47   :  { %v2481_v17 = vld [vmem:[#allocation8 + $0x64] ss:$16 sps:$4 sm:$0xff]   ;;  %v2483_v18 = vld [vmem:[#allocation8 + $0x6c] ss:$16 sps:$4 sm:$0xff]   ;;  %v2485_v19 = vld [vmem:[#allocation8 + $0x60] ss:$16 sps:$4 sm:$0xff]  }
  0x48   :  { %390 = vmatpush1.bf16.msra.mxu0 %v2467_v7  ;;  %503 = vmatpush1.bf16.msra.mxu1 %v2468_v8  ;;  %v2486_v20 = vld [vmem:[#allocation8 + $0x68] ss:$16 sps:$4 sm:$0xff]   ;;  %v2487_v21 = vld [vmem:[#allocation8 + $0x44] ss:$16 sps:$4 sm:$0xff]   ;;  %v2489_v22 = vld [vmem:[#allocation8 + $0x4c] ss:$16 sps:$4 sm:$0xff]  }
  0x49   :  { %391 = vmatprep.subr.bf16.mxu0 %v2469_v9  ;;  %504 = vmatprep.subr.bf16.mxu1 %v2471_v10  ;;  %v2491_v23 = vld [vmem:[#allocation8 + $0x40] ss:$16 sps:$4 sm:$0xff]   ;;  %v2492_v24 = vld [vmem:[#allocation8 + $0x48] ss:$16 sps:$4 sm:$0xff]   ;;  %v2493_v25 = vld [vmem:[#allocation8 + $0x24] ss:$16 sps:$4 sm:$0xff]  }
  0x4a   :  { %v2495_v26 = vld [vmem:[#allocation8 + $0x2c] ss:$16 sps:$4 sm:$0xff]   ;;  %v2497_v27 = vld [vmem:[#allocation8 + $0x20] ss:$16 sps:$4 sm:$0xff]   ;;  %v2498_v28 = vld [vmem:[#allocation8 + $0x28] ss:$16 sps:$4 sm:$0xff]  }
  0x4b   :  { %v2499_v29 = vld [vmem:[#allocation8 + $0x4] ss:$16 sps:$4 sm:$0xff]   ;;  %v2501_v30 = vld [vmem:[#allocation8 + $0xc] ss:$16 sps:$4 sm:$0xff]   ;;  %v2503_v31 = vld [vmem:[#allocation8] ss:$16 sps:$4 sm:$0xff]  }
  0x4c   :  { %392 = vmatpush1.bf16.msra.mxu0 %v2473_v11  ;;  %505 = vmatpush1.bf16.msra.mxu1 %v2474_v12  ;;  %v2504_v32 = vld [vmem:[#allocation8 + $0x8] ss:$16 sps:$4 sm:$0xff]   ;;  %v3111_v33 = vld [vmem:[#allocation10 + $0xe4] ss:$16 sps:$4 sm:$0xff]   ;;  %v3113_v34 = vld [vmem:[#allocation10 + $0xec] ss:$16 sps:$4 sm:$0xff]  }
  0x4d   :  { %393 = vmatprep.subr.bf16.mxu0 %v2475_v13  ;;  %506 = vmatprep.subr.bf16.mxu1 %v2477_v14  ;;  %v2505_v35 = vld [vmem:[#allocation5] sm:$0xff]   ;;  %v3121_v38 = vld [vmem:[#allocation10 + $0xe8] ss:$16 sps:$4 sm:$0xff]   ;;  %v3123_v39 = vld [vmem:[#allocation10 + $0xcc] ss:$16 sps:$4 sm:$0xff]   ;;  %v159_v13 = vlaneseq  ;;  %s3032_s9 = smov [#allocation17]  }
  0x4e   :  { %v3115_v36 = vld [vmem:[#allocation10 + $0xe0] ss:$16 sps:$4 sm:$0xff]   ;;  %v3118_v37 = vld [vmem:[#allocation10 + $0xc4] ss:$16 sps:$4 sm:$0xff]   ;;  %v3134_v42 = vld [vmem:[#allocation10 + $0xc8] ss:$16 sps:$4 sm:$0xff]  }
  0x4f   :  { %v3127_v40 = vld [vmem:[#allocation10 + $0xc0] ss:$16 sps:$4 sm:$0xff]   ;;  %v3131_v41 = vld [vmem:[#allocation10 + $0xa4] ss:$16 sps:$4 sm:$0xff]   ;;  %v3143_v46 = vld [vmem:[#allocation10 + $0xac] ss:$16 sps:$4 sm:$0xff]  }
  0x50   :  { %394 = vmatpush1.bf16.msra.mxu0 %v2479_v15  ;;  %507 = vmatpush1.bf16.msra.mxu1 %v2480_v16  ;;  %v3138_v44 = vld [vmem:[#allocation10 + $0xa0] ss:$16 sps:$4 sm:$0xff]   ;;  %v3140_v45 = vld [vmem:[#allocation10 + $0x84] ss:$16 sps:$4 sm:$0xff]   ;;  %v3146_v47 = vld [vmem:[#allocation10 + $0xa8] ss:$16 sps:$4 sm:$0xff]  }
  0x51   :  { %395 = vmatprep.subr.bf16.mxu0 %v2481_v17  ;;  %508 = vmatprep.subr.bf16.mxu1 %v2483_v18  ;;  %v3148_v48 = vld [vmem:[#allocation10 + $0x8c] ss:$16 sps:$4 sm:$0xff]   ;;  %v3153_v49 = vld [vmem:[#allocation10 + $0x80] ss:$16 sps:$4 sm:$0xff]   ;;  %v3155_v50 = vld [vmem:[#allocation10 + $0x64] ss:$16 sps:$4 sm:$0xff]  }
  0x52   :  { %v3160_v51 = vld [vmem:[#allocation10 + $0x88] ss:$16 sps:$4 sm:$0xff]   ;;  %v2513_v52 = vld [vmem:[#allocation5 + $0x10] sm:$0xff]   ;;  %v3166_v54 = vld [vmem:[#allocation10 + $0x6c] ss:$16 sps:$4 sm:$0xff]   ;;  %v160_v14 = vshrl.u32 %v159_v13, 7 }
  0x53   :  { %v3163_v53 = vld [vmem:[#allocation10 + $0x60] ss:$16 sps:$4 sm:$0xff]   ;;  %v3169_v55 = vld [vmem:[#allocation10 + $0x44] ss:$16 sps:$4 sm:$0xff]   ;;  %v3172_v56 = vld [vmem:[#allocation10 + $0x68] ss:$16 sps:$4 sm:$0xff]  }
  0x54   :  { %396 = vmatpush1.bf16.msra.mxu0 %v2485_v19  ;;  %509 = vmatpush1.bf16.msra.mxu1 %v2486_v20  ;;  %v3174_v57 = vld [vmem:[#allocation10 + $0x4c] ss:$16 sps:$4 sm:$0xff]   ;;  %v3179_v58 = vld [vmem:[#allocation10 + $0x40] ss:$16 sps:$4 sm:$0xff]   ;;  %v3183_v59 = vld [vmem:[#allocation10 + $0x24] ss:$16 sps:$4 sm:$0xff]  }
  0x55   :  { %397 = vmatprep.subr.bf16.mxu0 %v2487_v21  ;;  %510 = vmatprep.subr.bf16.mxu1 %v2489_v22  ;;  %v3186_v60 = vld [vmem:[#allocation10 + $0x48] ss:$16 sps:$4 sm:$0xff]   ;;  %v3190_v62 = vld [vmem:[#allocation10 + $0x20] ss:$16 sps:$4 sm:$0xff]   ;;  %v3192_v63 = vld [vmem:[#allocation10 + $0x2c] ss:$16 sps:$4 sm:$0xff]  }
  0x56   :  { %v2520_v61 = vld [vmem:[#allocation5 + $0x18] sm:$0xff]   ;;  %v3196_v1 = vld [vmem:[#allocation10 + $0x4] ss:$16 sps:$4 sm:$0xff]   ;;  %v3206_v4 = vld [vmem:[#allocation10] ss:$16 sps:$4 sm:$0xff]   ;;  %v161_v19 = vsub.s32 0, %v160_v14 }
  0x57   :  { %v3198_v2 = vld [vmem:[#allocation10 + $0x28] ss:$16 sps:$4 sm:$0xff]   ;;  %v3200_v3 = vld [vmem:[#allocation10 + $0xc] ss:$16 sps:$4 sm:$0xff]   ;;  %v2527_v6 = vld [vmem:[#allocation5 + $0x20] sm:$0xff]   ;;  %v169_v20 = vsub.s32 2, %v160_v14 }
  0x58   :  { %398 = vmatpush1.bf16.msra.mxu0 %v2491_v23  ;;  %511 = vmatpush1.bf16.msra.mxu1 %v2492_v24  ;;  %v3210_v5 = vld [vmem:[#allocation10 + $0x8] ss:$16 sps:$4 sm:$0xff]   ;;  %v2541_v8 = vld [vmem:[#allocation5 + $0x30] sm:$0xff]   ;;  %v101_v10 = vld [vmem:[#allocation11] sm:$0xff]  ;;  %v165_v24 = vsub.s32 1, %v160_v14  ;;  %s2222_s13 = sshll.u32 %s3032_s9, 4  ;;  %s2223_s13 = int_to_ptr.vmem [resolvable:$true] %s2222_s13 }
  0x59   :  { %399 = vmatprep.subr.bf16.mxu0 %v2493_v25  ;;  %512 = vmatprep.subr.bf16.mxu1 %v2495_v26  ;;  %v2534_v7 = vld [vmem:[#allocation5 + $0x28] sm:$0xff]   ;;  %v2551_v9 = vld [vmem:[#allocation5 + $0x38] sm:$0xff]   ;;  %v157_v21 = vld [vmem:[%s3869_s3] sm:$0xf]  ;;  %v173_v25 = vsub.s32 3, %v160_v14  ;;  %s3031_s3 = smov [#allocation15]  }
  0x5a   :  { %v102_v11 = vld [vmem:[#allocation11 + $0x8] sm:$0xff]  ;;  %s2210_s30 = sshll.u32 %s3031_s3, 4  ;;  %s3033_s14 = smov [#allocation14]   ;;  %s2211_s30 = int_to_ptr.vmem [resolvable:$true] %s2210_s30 }
  0x5b   :  { %v724_v12 = vpack.c.bf16 %v102_v11, %v101_v10  ;;  %s2198_s17 = sshll.u32 %s3033_s14, 4  ;;  %s2949_s18 = scalar_lea.vmem %s2211_s30, 256  ;;  %s2199_s17 = int_to_ptr.vmem [resolvable:$true] %s2198_s17 }
  0x5c   :  { %400 = vmatpush1.bf16.msra.mxu0 %v2497_v27  ;;  %513 = vmatpush1.bf16.msra.mxu1 %v2498_v28  ;;  %v3278_v28 = vrot.slane %v157_v21, %v161_v19  ;;  %p2950_p11 = scmp.ne.s32.totalorder %s2211_s30, %s2949_s18  ;;  %p2954_p12 = scmp.lt.s32.totalorder %s2211_s30, %s2211_s30 }
  0x5d   :  { %401 = vmatprep.subr.bf16.mxu0 %v2499_v29  ;;  %514 = vmatprep.subr.bf16.mxu1 %v2501_v30  ;;  %v3280_v29 = vrot.slane %v157_v21, %v169_v20  ;;  %p2955_p13 = scmp.lt.s32.totalorder %s2949_s18, %s2949_s18 }
  0x5f   :  { %p2956_p0 = por %p2955_p13, %p2954_p12 }
  0x60   :  { %402 = vmatpush1.bf16.msra.mxu0 %v2503_v31  ;;  %515 = vmatpush1.bf16.msra.mxu1 %v2504_v32  ;;  %v3282_v32 = vrot.slane %v157_v21, %v165_v24 }
  0x61   :  { %885 = vmatprep.subr.bf16.mxu0 %v3111_v33  ;;  %928 = vmatprep.subr.bf16.mxu1 %v3113_v34  ;;  %p2957_p1 = pnand %p2956_p0, %p2950_p11 }
  0x63   :  { %420 = vmatmul.mubr.bf16.vlgmr.msra.gmra.mxu0 %v2505_v35  ;;  %533 = vmatmul.mubr.bf16.vlgmr.msra.gmra.mxu1 %v2505_v35  ;;  %v3284_v35 = vrot.slane %v157_v21, %v173_v25 }
  0x64   :  { %886 = vmatpush1.bf16.msra.mxu0 %v3115_v36  ;;  %429 = vmatprep.mubr.bf16.mxu0 %v3875_v0 }
  0x65   :  { %542 = vmatprep.mubr.bf16.mxu1 %v3875_v0  ;;  %887 = vmatprep.subr.bf16.mxu0 %v3118_v37 }
  0x66   :  { %929 = vmatpush1.bf16.msra.mxu1 %v3121_v38 }
  0x67   :  { %930 = vmatprep.subr.bf16.mxu1 %v3123_v39 }
  0x68   :  { %888 = vmatpush1.bf16.msra.mxu0 %v3127_v40 }
  0x69   :  { %889 = vmatprep.subr.bf16.mxu0 %v3131_v41 }
  0x6a   :  { %931 = vmatpush1.bf16.msra.mxu1 %v3134_v42 }
  0x6b   :  { %430 = vmatmul.mubr.bf16.gmra.mxu0 %v2509_v43  ;;  %543 = vmatmul.mubr.bf16.gmra.mxu1 %v2509_v43 }
  0x6c   :  { %439 = vmatprep.mubr.bf16.mxu0 %v3875_v0  ;;  %552 = vmatprep.mubr.bf16.mxu1 %v3875_v0 }
  0x6d   :  { %890 = vmatpush1.bf16.msra.mxu0 %v3138_v44  ;;  %932 = vmatprep.subr.bf16.mxu1 %v3143_v46 }
  0x6e   :  { %891 = vmatprep.subr.bf16.mxu0 %v3140_v45  ;;  %933 = vmatpush1.bf16.msra.mxu1 %v3146_v47 }
  0x6f   :  { %934 = vmatprep.subr.bf16.mxu1 %v3148_v48 }
  0x71   :  { %892 = vmatpush1.bf16.msra.mxu0 %v3153_v49 }
  0x72   :  { %893 = vmatprep.subr.bf16.mxu0 %v3155_v50  ;;  %935 = vmatpush1.bf16.msra.mxu1 %v3160_v51 }
  0x73   :  { %440 = vmatmul.mubr.bf16.gmra.mxu0 %v2513_v52  ;;  %553 = vmatmul.mubr.bf16.gmra.mxu1 %v2513_v52 }
  0x74   :  { %449 = vmatprep.mubr.bf16.mxu0 %v3875_v0  ;;  %562 = vmatprep.mubr.bf16.mxu1 %v3875_v0 }
  0x75   :  { %894 = vmatpush1.bf16.msra.mxu0 %v3163_v53  ;;  %936 = vmatprep.subr.bf16.mxu1 %v3166_v54 }
  0x76   :  { %895 = vmatprep.subr.bf16.mxu0 %v3169_v55  ;;  %937 = vmatpush1.bf16.msra.mxu1 %v3172_v56 }
  0x77   :  { %938 = vmatprep.subr.bf16.mxu1 %v3174_v57 }
  0x79   :  { %896 = vmatpush1.bf16.msra.mxu0 %v3179_v58 }
  0x7a   :  { %897 = vmatprep.subr.bf16.mxu0 %v3183_v59  ;;  %939 = vmatpush1.bf16.msra.mxu1 %v3186_v60 }
  0x7b   :  { %450 = vmatmul.mubr.bf16.gmra.mxu0 %v2520_v61  ;;  %563 = vmatmul.mubr.bf16.gmra.mxu1 %v2520_v61 }
  0x7c   :  { %459 = vmatprep.mubr.bf16.mxu0 %v3875_v0  ;;  %572 = vmatprep.mubr.bf16.mxu1 %v3875_v0 }
  0x7d   :  { %898 = vmatpush1.bf16.msra.mxu0 %v3190_v62  ;;  %940 = vmatprep.subr.bf16.mxu1 %v3192_v63 }
  0x7e   :  { %899 = vmatprep.subr.bf16.mxu0 %v3196_v1  ;;  %941 = vmatpush1.bf16.msra.mxu1 %v3198_v2 }
  0x7f   :  { %942 = vmatprep.subr.bf16.mxu1 %v3200_v3 }
  0x81   :  { %900 = vmatpush1.bf16.msra.mxu0 %v3206_v4 }
  0x82   :  { %943 = vmatpush1.bf16.msra.mxu1 %v3210_v5  ;;  %1048 = vmatprep.subr.bf16.mxu0 %v3111_v33 }
  0x83   :  { %460 = vmatmul.mubr.bf16.gmra.mxu0 %v2527_v6  ;;  %573 = vmatmul.mubr.bf16.gmra.mxu1 %v2527_v6 }
  0x84   :  { %469 = vmatprep.mubr.bf16.mxu0 %v3875_v0  ;;  %582 = vmatprep.mubr.bf16.mxu1 %v3875_v0 }
  0x85   :  { %1091 = vmatprep.subr.bf16.mxu1 %v3113_v34 }
  0x8b   :  { %470 = vmatmul.mubr.bf16.gmra.mxu0 %v2534_v7  ;;  %583 = vmatmul.mubr.bf16.gmra.mxu1 %v2534_v7 }
  0x8c   :  { %479 = vmatprep.mubr.bf16.mxu0 %v3875_v0  ;;  %592 = vmatprep.mubr.bf16.mxu1 %v3875_v0 }
  0x93   :  { %480 = vmatmul.mubr.bf16.gmra.mxu0 %v2541_v8  ;;  %593 = vmatmul.mubr.bf16.gmra.mxu1 %v2541_v8 }
  0x94   :  { %489 = vmatprep.mubr.bf16.mxu0 %v3875_v0  ;;  %602 = vmatprep.mubr.bf16.mxu1 %v3875_v0 }
  0x9b   :  { %490 = vmatmul.mubr.bf16.gmra.mxu0 %v2551_v9  ;;  %603 = vmatmul.mubr.bf16.gmra.mxu1 %v2551_v9 }
  0x9c   :  { %917 = vmatprep.mubr.bf16.mxu0 %v3875_v0  ;;  %960 = vmatprep.mubr.bf16.mxu1 %v3875_v0 }
  0xa3   :  { %918 = vmatmul.mubr.bf16.vlgmr.msra.gmra.mxu0 %v724_v12  ;;  %961 = vmatmul.mubr.bf16.vlgmr.msra.gmra.mxu1 %v724_v12 }
  0xa4   :  { %1049 = vmatpush1.bf16.msra.mxu0 %v3115_v36  ;;  %1092 = vmatpush1.bf16.msra.mxu1 %v3121_v38 }
  0xa5   :  { %1050 = vmatprep.subr.bf16.mxu0 %v3118_v37  ;;  %1093 = vmatprep.subr.bf16.mxu1 %v3123_v39 }
  0xa6   :  { %1080 = vmatprep.mubr.bf16.mxu0 %v3875_v0  ;;  %1123 = vmatprep.mubr.bf16.mxu1 %v3875_v0 }
  0xa8   :  { %1051 = vmatpush1.bf16.msra.mxu0 %v3127_v40  ;;  %1094 = vmatpush1.bf16.msra.mxu1 %v3134_v42 }
  0xa9   :  { %1052 = vmatprep.subr.bf16.mxu0 %v3131_v41  ;;  %1095 = vmatprep.subr.bf16.mxu1 %v3143_v46 }
  0xac   :  { %1053 = vmatpush1.bf16.msra.mxu0 %v3138_v44  ;;  %1096 = vmatpush1.bf16.msra.mxu1 %v3146_v47 }
  0xad   :  { %1054 = vmatprep.subr.bf16.mxu0 %v3140_v45  ;;  %1097 = vmatprep.subr.bf16.mxu1 %v3148_v48 }
  0xb0   :  { %1055 = vmatpush1.bf16.msra.mxu0 %v3153_v49  ;;  %1098 = vmatpush1.bf16.msra.mxu1 %v3160_v51 }
  0xb1   :  { %1056 = vmatprep.subr.bf16.mxu0 %v3155_v50  ;;  %1099 = vmatprep.subr.bf16.mxu1 %v3166_v54 }
  0xb4   :  { %1057 = vmatpush1.bf16.msra.mxu0 %v3163_v53  ;;  %1100 = vmatpush1.bf16.msra.mxu1 %v3172_v56 }
  0xb5   :  { %1058 = vmatprep.subr.bf16.mxu0 %v3169_v55  ;;  %1101 = vmatprep.subr.bf16.mxu1 %v3174_v57 }
  0xb8   :  { %1059 = vmatpush1.bf16.msra.mxu0 %v3179_v58  ;;  %1102 = vmatpush1.bf16.msra.mxu1 %v3186_v60 }
  0xb9   :  { %1060 = vmatprep.subr.bf16.mxu0 %v3183_v59  ;;  %1103 = vmatprep.subr.bf16.mxu1 %v3192_v63 }
  0xbc   :  { %1061 = vmatpush1.bf16.msra.mxu0 %v3190_v62  ;;  %1104 = vmatpush1.bf16.msra.mxu1 %v3198_v2 }
  0xbd   :  { %1062 = vmatprep.subr.bf16.mxu0 %v3196_v1  ;;  %1105 = vmatprep.subr.bf16.mxu1 %v3200_v3 }
  0xc0   :  { %1063 = vmatpush1.bf16.msra.mxu0 %v3206_v4  ;;  %1106 = vmatpush1.bf16.msra.mxu1 %v3210_v5 }
  0xc1   :  { %1212 = vmatprep.subr.bf16.mxu0 %v3111_v33  ;;  %1255 = vmatprep.subr.bf16.mxu1 %v3113_v34 }
 0x123   :  { %v3259_v15 = vpop.f32.mrf.mxu0  ;;  %v3261_v16 = vpop.f32.mrf.mxu1 }
 0x125   :  { %v3263_v17 = vpop.f32.mrf.mxu0  ;;  %v3265_v18 = vpop.f32.mrf.mxu1 }
 0x127   :  { %v3270_v22 = vpop.f32.mrf.mxu0  ;;  %v3272_v23 = vpop.f32.mrf.mxu1 }
 0x129   :  { %v3274_v26 = vpop.f32.mrf.mxu0  ;;  %v3276_v27 = vpop.f32.mrf.mxu1 }
 0x12b   :  { %v431_v30 = vpop.f32.mrf.mxu0  ;;  %v544_v31 = vpop.f32.mrf.mxu1 }
 0x12c   :  { %v3287_v43 = vadd.f32 %v431_v30, %v3278_v28  ;;  %v3290_v52 = vadd.f32 %v544_v31, %v3280_v29 }
 0x12d   :  { %v433_v61 = vpop.f32.mrf.mxu0  ;;  %v546_v6 = vpop.f32.mrf.mxu1 }
 0x12e   :  { %3877 = vst [vmem:[#allocation23_spill] sm:$0xff] %v3290_v52  ;;  %v3293_v7 = vadd.f32 %v433_v61, %v3282_v32  ;;  %v3296_v8 = vadd.f32 %v546_v6, %v3284_v35 }
 0x12f   :  { %v435_v9 = vpop.f32.mrf.mxu0  ;;  %v548_v10 = vpop.f32.mrf.mxu1 }
 0x130   :  { %v3299_v11 = vadd.f32 %v435_v9, %v3278_v28  ;;  %v3302_v12 = vadd.f32 %v548_v10, %v3280_v29 }
 0x131   :  { %v437_v13 = vpop.f32.mrf.mxu0  ;;  %v550_v14 = vpop.f32.mrf.mxu1 }
 0x132   :  { %3878 = vst [vmem:[#allocation24_spill] sm:$0xff] %v3302_v12  ;;  %v3305_v19 = vadd.f32 %v437_v13, %v3282_v32  ;;  %v3308_v20 = vadd.f32 %v550_v14, %v3284_v35 }
 0x133   :  { %v441_v21 = vpop.f32.mrf.mxu0  ;;  %v554_v24 = vpop.f32.mrf.mxu1 }
 0x134   :  { %3879 = vst [vmem:[#allocation25_spill] sm:$0xff] %v3308_v20  ;;  %v3311_v25 = vadd.f32 %v441_v21, %v3278_v28  ;;  %v3314_v30 = vadd.f32 %v554_v24, %v3280_v29 }
 0x135   :  { %v443_v31 = vpop.f32.mrf.mxu0  ;;  %v556_v61 = vpop.f32.mrf.mxu1 }
 0x136   :  { %3880 = vst [vmem:[#allocation26_spill] sm:$0xff] %v3311_v25  ;;  %3881 = vst [vmem:[#allocation27_spill] sm:$0xff] %v3314_v30  ;;  %v3317_v6 = vadd.f32 %v443_v31, %v3282_v32  ;;  %v3320_v9 = vadd.f32 %v556_v61, %v3284_v35 }
 0x137   :  { %v445_v10 = vpop.f32.mrf.mxu0  ;;  %v558_v13 = vpop.f32.mrf.mxu1 }
 0x138   :  { %3882 = vst [vmem:[#allocation28_spill] sm:$0xff] %v3317_v6  ;;  %3883 = vst [vmem:[#allocation29_spill] sm:$0xff] %v3320_v9  ;;  %v3323_v14 = vadd.f32 %v445_v10, %v3278_v28  ;;  %v3326_v0 = vadd.f32 %v558_v13, %v3280_v29 }
 0x139   :  { %v447_v21 = vpop.f32.mrf.mxu0  ;;  %v560_v25 = vpop.f32.mrf.mxu1 }
 0x13a   :  { %3884 = vst [vmem:[#allocation30_spill] sm:$0xff] %v3323_v14  ;;  %3885 = vst [vmem:[#allocation31_spill] sm:$0xff] %v3326_v0  ;;  %v3329_v24 = vadd.f32 %v447_v21, %v3282_v32  ;;  %v3332_v30 = vadd.f32 %v560_v25, %v3284_v35 }
 0x13b   :  { %v451_v31 = vpop.f32.mrf.mxu0  ;;  %v564_v6 = vpop.f32.mrf.mxu1 }
 0x13c   :  { %3886 = vst [vmem:[#allocation32_spill] sm:$0xff] %v3329_v24  ;;  %3887 = vst [vmem:[#allocation33_spill] sm:$0xff] %v3332_v30  ;;  %v3335_v61 = vadd.f32 %v451_v31, %v3278_v28  ;;  %v3338_v9 = vadd.f32 %v564_v6, %v3280_v29 }
 0x13d   :  { %v453_v10 = vpop.f32.mrf.mxu0  ;;  %v566_v14 = vpop.f32.mrf.mxu1 }
 0x13e   :  { %3888 = vst [vmem:[#allocation34_spill] sm:$0xff] %v3335_v61  ;;  %3889 = vst [vmem:[#allocation35_spill] sm:$0xff] %v3338_v9  ;;  %v3341_v13 = vadd.f32 %v453_v10, %v3282_v32  ;;  %v3344_v0 = vadd.f32 %v566_v14, %v3284_v35 }
 0x13f   :  { %v455_v21 = vpop.f32.mrf.mxu0  ;;  %v568_v24 = vpop.f32.mrf.mxu1 }
 0x140   :  { %3890 = vst [vmem:[#allocation36_spill] sm:$0xff] %v3341_v13  ;;  %3891 = vst [vmem:[#allocation37_spill] sm:$0xff] %v3344_v0  ;;  %v3347_v25 = vadd.f32 %v455_v21, %v3278_v28  ;;  %v3350_v30 = vadd.f32 %v568_v24, %v3280_v29 }
 0x141   :  { %v457_v31 = vpop.f32.mrf.mxu0  ;;  %v570_v61 = vpop.f32.mrf.mxu1 }
 0x142   :  { %3892 = vst [vmem:[#allocation38_spill] sm:$0xff] %v3347_v25  ;;  %3893 = vst [vmem:[#allocation39_spill] sm:$0xff] %v3350_v30  ;;  %v3353_v6 = vadd.f32 %v457_v31, %v3282_v32  ;;  %v3356_v9 = vadd.f32 %v570_v61, %v3284_v35 }
 0x143   :  { %v461_v10 = vpop.f32.mrf.mxu0  ;;  %v574_v13 = vpop.f32.mrf.mxu1 }
 0x144   :  { %3894 = vst [vmem:[#allocation40_spill] sm:$0xff] %v3353_v6  ;;  %3895 = vst [vmem:[#allocation41_spill] sm:$0xff] %v3356_v9  ;;  %v3359_v14 = vadd.f32 %v461_v10, %v3278_v28  ;;  %v3362_v0 = vadd.f32 %v574_v13, %v3280_v29 }
 0x145   :  { %v463_v21 = vpop.f32.mrf.mxu0  ;;  %v576_v25 = vpop.f32.mrf.mxu1 }
 0x146   :  { %3896 = vst [vmem:[#allocation42_spill] sm:$0xff] %v3359_v14  ;;  %3897 = vst [vmem:[#allocation43_spill] sm:$0xff] %v3362_v0  ;;  %v3365_v24 = vadd.f32 %v463_v21, %v3282_v32  ;;  %v3368_v30 = vadd.f32 %v576_v25, %v3284_v35 }
 0x147   :  { %v465_v31 = vpop.f32.mrf.mxu0  ;;  %v578_v6 = vpop.f32.mrf.mxu1 }
 0x148   :  { %3898 = vst [vmem:[#allocation44_spill] sm:$0xff] %v3365_v24  ;;  %3899 = vst [vmem:[#allocation45_spill] sm:$0xff] %v3368_v30  ;;  %v3371_v61 = vadd.f32 %v465_v31, %v3278_v28  ;;  %v3374_v9 = vadd.f32 %v578_v6, %v3280_v29 }
 0x149   :  { %v467_v10 = vpop.f32.mrf.mxu0  ;;  %v580_v14 = vpop.f32.mrf.mxu1 }
 0x14a   :  { %3900 = vst [vmem:[#allocation46_spill] sm:$0xff] %v3371_v61  ;;  %3901 = vst [vmem:[#allocation47_spill] sm:$0xff] %v3374_v9  ;;  %v3377_v13 = vadd.f32 %v467_v10, %v3282_v32  ;;  %v3380_v0 = vadd.f32 %v580_v14, %v3284_v35 }
 0x14b   :  { %v471_v21 = vpop.f32.mrf.mxu0  ;;  %v584_v24 = vpop.f32.mrf.mxu1 }
 0x14c   :  { %3902 = vst [vmem:[#allocation48_spill] sm:$0xff] %v3377_v13  ;;  %3903 = vst [vmem:[#allocation49_spill] sm:$0xff] %v3380_v0  ;;  %v3383_v25 = vadd.f32 %v471_v21, %v3278_v28  ;;  %v3386_v30 = vadd.f32 %v584_v24, %v3280_v29 }
 0x14d   :  { %v473_v31 = vpop.f32.mrf.mxu0  ;;  %v586_v61 = vpop.f32.mrf.mxu1 }
 0x14e   :  { %3904 = vst [vmem:[#allocation50_spill] sm:$0xff] %v3383_v25  ;;  %3905 = vst [vmem:[#allocation51_spill] sm:$0xff] %v3386_v30  ;;  %v3389_v6 = vadd.f32 %v473_v31, %v3282_v32  ;;  %v3392_v9 = vadd.f32 %v586_v61, %v3284_v35 }
 0x14f   :  { %v475_v10 = vpop.f32.mrf.mxu0  ;;  %v588_v13 = vpop.f32.mrf.mxu1 }
 0x150   :  { %3906 = vst [vmem:[#allocation52_spill] sm:$0xff] %v3389_v6  ;;  %3907 = vst [vmem:[#allocation53_spill] sm:$0xff] %v3392_v9  ;;  %v3395_v14 = vadd.f32 %v475_v10, %v3278_v28  ;;  %v3398_v0 = vadd.f32 %v588_v13, %v3280_v29 }
 0x151   :  { %v477_v21 = vpop.f32.mrf.mxu0  ;;  %v590_v25 = vpop.f32.mrf.mxu1 }
 0x152   :  { %3908 = vst [vmem:[#allocation54_spill] sm:$0xff] %v3395_v14  ;;  %3909 = vst [vmem:[#allocation55_spill] sm:$0xff] %v3398_v0  ;;  %v3401_v24 = vadd.f32 %v477_v21, %v3282_v32  ;;  %v3404_v30 = vadd.f32 %v590_v25, %v3284_v35 }
 0x153   :  { %v481_v31 = vpop.f32.mrf.mxu0  ;;  %v594_v6 = vpop.f32.mrf.mxu1 }
 0x154   :  { %3910 = vst [vmem:[#allocation56_spill] sm:$0xff] %v3401_v24  ;;  %3911 = vst [vmem:[#allocation57_spill] sm:$0xff] %v3404_v30  ;;  %v3407_v61 = vadd.f32 %v481_v31, %v3278_v28  ;;  %v3410_v9 = vadd.f32 %v594_v6, %v3280_v29 }
 0x155   :  { %v483_v10 = vpop.f32.mrf.mxu0  ;;  %v596_v14 = vpop.f32.mrf.mxu1 }
 0x156   :  { %3912 = vst [vmem:[#allocation58_spill] sm:$0xff] %v3407_v61  ;;  %3913 = vst [vmem:[#allocation59_spill] sm:$0xff] %v3410_v9  ;;  %v3413_v13 = vadd.f32 %v483_v10, %v3282_v32  ;;  %v3416_v0 = vadd.f32 %v596_v14, %v3284_v35 }
 0x157   :  { %v485_v21 = vpop.f32.mrf.mxu0  ;;  %v598_v24 = vpop.f32.mrf.mxu1 }
 0x158   :  { %3914 = vst [vmem:[#allocation60_spill] sm:$0xff] %v3413_v13  ;;  %3915 = vst [vmem:[#allocation61_spill] sm:$0xff] %v3416_v0  ;;  %v3419_v25 = vadd.f32 %v485_v21, %v3278_v28  ;;  %v3422_v30 = vadd.f32 %v598_v24, %v3280_v29 }
 0x159   :  { %v487_v31 = vpop.f32.mrf.mxu0  ;;  %v600_v61 = vpop.f32.mrf.mxu1 }
 0x15a   :  { %3916 = vst [vmem:[#allocation62_spill] sm:$0xff] %v3419_v25  ;;  %3917 = vst [vmem:[#allocation63_spill] sm:$0xff] %v3422_v30  ;;  %v3425_v6 = vadd.f32 %v487_v31, %v3282_v32  ;;  %v3428_v9 = vadd.f32 %v600_v61, %v3284_v35 }
 0x15b   :  { %v491_v10 = vpop.f32.mrf.mxu0  ;;  %v604_v13 = vpop.f32.mrf.mxu1 }
 0x15c   :  { %3918 = vst [vmem:[#allocation64_spill] sm:$0xff] %v3425_v6  ;;  %3919 = vst [vmem:[#allocation65_spill] sm:$0xff] %v3428_v9  ;;  %v3431_v14 = vadd.f32 %v491_v10, %v3278_v28  ;;  %v3434_v0 = vadd.f32 %v604_v13, %v3280_v29  ;;  %v422_v13 = vadd.f32 %v3259_v15, %v3278_v28 }
 0x15d   :  { %v493_v21 = vpop.f32.mrf.mxu0  ;;  %v606_v25 = vpop.f32.mrf.mxu1  ;;  %v428_v15 = vadd.f32 %v3274_v26, %v3282_v32 }
 0x15e   :  { %3920 = vst [vmem:[#allocation66_spill] sm:$0xff] %v3431_v14  ;;  %3921 = vst [vmem:[#allocation67_spill] sm:$0xff] %v3434_v0  ;;  %v3437_v24 = vadd.f32 %v493_v21, %v3282_v32  ;;  %v3440_v30 = vadd.f32 %v606_v25, %v3284_v35 }
 0x15f   :  { %v495_v31 = vpop.f32.mrf.mxu0  ;;  %v608_v6 = vpop.f32.mrf.mxu1 }
 0x160   :  { %3922 = vst [vmem:[#allocation68_spill] sm:$0xff] %v3437_v24  ;;  %3923 = vst [vmem:[#allocation69_spill] sm:$0xff] %v3440_v30  ;;  %v3443_v61 = vadd.f32 %v495_v31, %v3278_v28  ;;  %v3446_v9 = vadd.f32 %v608_v6, %v3280_v29  ;;  %v424_v30 = vadd.f32 %v3263_v17, %v3282_v32 }
 0x161   :  { %v497_v10 = vpop.f32.mrf.mxu0  ;;  %v610_v14 = vpop.f32.mrf.mxu1  ;;  %v426_v6 = vadd.f32 %v3270_v22, %v3278_v28  ;;  %v537_v22 = vadd.f32 %v3265_v18, %v3284_v35 }
 0x162   :  { %3924 = vst [vmem:[#allocation70_spill] sm:$0xff] %v3443_v61  ;;  %3925 = vst [vmem:[#allocation71_spill] sm:$0xff] %v3446_v9  ;;  %v3451_v0 = vadd.f32 %v497_v10, %v3282_v32  ;;  %v3454_v21 = vadd.f32 %v610_v14, %v3284_v35  ;;  %v541_v32 = vadd.f32 %v3276_v27, %v3284_v35 }
 0x163   :  { %v919_v25 = vpop.f32.mrf.mxu0  ;;  %v962_v61 = vpop.f32.mrf.mxu1 }
 0x164   :  { %3926 = vst [vmem:[#allocation72_spill] sm:$0xff] %v3451_v0  ;;  %3927 = vst [vmem:[#allocation73_spill] sm:$0xff] %v3454_v21  ;;  %v971_v31 = vadd.f32 %v919_v25, %v422_v13 }
 0x165   :  { %v921_v24 = vpop.f32.mrf.mxu0  ;;  %v964_v14 = vpop.f32.mrf.mxu1 }
 0x166   :  { %v2322_v9 = vmul.f32 -1.442695, %v971_v31  ;;  %v972_v12 = vadd.f32 %v921_v24, %v424_v30  ;;  %v974_v28 = vadd.f32 %v964_v14, %v537_v22  ;;  %v535_v30 = vadd.f32 %v3261_v16, %v3280_v29 }
 0x167   :  { %v923_v20 = vpop.f32.mrf.mxu0  ;;  %v966_v13 = vpop.f32.mrf.mxu1 }
 0x168   :  { %2561 = vpow2.f32 %v2322_v9  ;;  %v2324_v10 = vmul.f32 -1.442695, %v972_v12  ;;  %v975_v21 = vadd.f32 %v923_v20, %v426_v6  ;;  %v973_v12 = vadd.f32 %v962_v61, %v535_v30 }
 0x169   :  { %v925_v0 = vpop.f32.mrf.mxu0  ;;  %v968_v26 = vpop.f32.mrf.mxu1  ;;  %v539_v20 = vadd.f32 %v3272_v23, %v3280_v29 }
 0x16a   :  { %2563 = vpow2.f32 %v2324_v10  ;;  %v2323_v52 = vmul.f32 -1.442695, %v975_v21  ;;  %v976_v17 = vadd.f32 %v925_v0, %v428_v15  ;;  %v2326_v0 = vmul.f32 -1.442695, %v974_v28  ;;  %v105_v10 = vld [vmem:[#allocation13] sm:$0xff] }
 0x16b   :  { %v977_v24 = vadd.f32 %v966_v13, %v539_v20 }
 0x16c   :  { %2565 = vpow2.f32 %v2323_v52  ;;  %v2325_v25 = vmul.f32 -1.442695, %v976_v17  ;;  %v978_v52 = vadd.f32 %v968_v26, %v541_v32  ;;  %v106_v26 = vld [vmem:[#allocation13 + $0x8] sm:$0xff] }
 0x16e   :  { %2567 = vpow2.f32 %v2325_v25  ;;  %v2327_v31 = vmul.f32 -1.442695, %v978_v52 }
 0x16f   :  { %2569 = vtanh.f32 %v973_v12 }
 0x170   :  { %2571 = vpow2.f32 %v2326_v0 }
 0x175   :  { %v2562_v9 = vpop.eup %2561 }
 0x176   :  { %v985_v21 = vadd.f32 1.0, %v2562_v9 }
 0x177   :  { %v2564_v18 = vpop.eup %2563 }
 0x178   :  { %2573 = vrcp.f32 %v985_v21  ;;  %v997_v6 = vadd.f32 1.0, %v2564_v18 }
 0x179   :  { %v2566_v16 = vpop.eup %2565  ;;  %2575 = vtanh.f32 %v977_v24 }
 0x17a   :  { %2577 = vrcp.f32 %v997_v6  ;;  %v986_v15 = vadd.f32 1.0, %v2566_v16 }
 0x17b   :  { %v2568_v27 = vpop.eup %2567  ;;  %2579 = vpow2.f32 %v2327_v31 }
 0x17c   :  { %2581 = vrcp.f32 %v986_v15  ;;  %v998_v35 = vadd.f32 1.0, %v2568_v27  ;;  %v2570_v23 = vpop.eup %2569  ;;  %v3928_v27 = vmov 0  }
 0x17d   :  { %v2572_v29 = vpop.eup %2571 }
 0x17e   :  { %2583 = vrcp.f32 %v998_v35  ;;  %v1011_v30 = vadd.f32 1.0, %v2572_v29 }
 0x180   :  { %2585 = vrcp.f32 %v1011_v30 }
 0x185   :  { %v2574_v61 = vpop.eup %2573 }
 0x186   :  { %v2576_v14 = vpop.eup %2575  ;;  %v1019_v17 = vmul.f32 %v2574_v61, %v2570_v23 }
 0x187   :  { %v2578_v13 = vpop.eup %2577 }
 0x188   :  { %v2580_v25 = vpop.eup %2579  ;;  %v1017_v22 = vmul.f32 %v2578_v13, %v105_v10 }
 0x189   :  { %v2582_v28 = vpop.eup %2581  ;;  %v1012_v0 = vadd.f32 1.0, %v2580_v25 }
 0x18a   :  { %v3470_v32 = vadd.f32 %v1019_v17, %v1017_v22  ;;  %v1020_v12 = vmul.f32 %v2582_v28, %v2576_v14 }
 0x18b   :  { %v2584_v20 = vpop.eup %2583 }
 0x18c   :  { %v1018_v52 = vmul.f32 %v2584_v20, %v106_v26  ;;  %2587 = vtanh.f32 %v3470_v32  ;;  %v3929_v20 = vld [vmem:[#allocation23_spill] sm:$0xff] }
 0x18d   :  { %2589 = vrcp.f32 %v1012_v0  ;;  %v2586_v24 = vpop.eup %2585 }
 0x18e   :  { %v3472_v9 = vadd.f32 %v1020_v12, %v1018_v52  ;;  %v3930_v52 = vld [vmem:[#allocation25_spill] sm:$0xff] }
 0x190   :  { %2591 = vtanh.f32 %v3472_v9 }
 0x199   :  { %v2588_v21 = vpop.eup %2587 }
 0x19a   :  { %v2590_v18 = vpop.eup %2589  ;;  %v1025_v6 = vmul.f32 %v2588_v21, %v2586_v24 }
 0x19d   :  { %v2592_v31 = vpop.eup %2591 }
 0x19e   :  { %v1026_v16 = vmul.f32 %v2592_v31, %v2590_v18  ;;  %v3931_v18 = vld [vmem:[#allocation24_spill] sm:$0xff] }
 0x1a0   :  { %v1027_v15 = vpack.c.bf16 %v1026_v16, %v1025_v6 }
 0x1a2   :  { %2406 = vst [vmem:[#allocation14] sm:$0xff] %v1027_v15   ;;  %1081 = vmatmul.mubr.bf16.vlgmr.msra.gmra.mxu0 %v1027_v15  ;;  %1124 = vmatmul.mubr.bf16.vlgmr.msra.gmra.mxu1 %v1027_v15 }
 0x1a3   :  { %1213 = vmatpush1.bf16.msra.mxu0 %v3115_v36  ;;  %1256 = vmatpush1.bf16.msra.mxu1 %v3121_v38 }
 0x1a4   :  { %1214 = vmatprep.subr.bf16.mxu0 %v3118_v37  ;;  %1257 = vmatprep.subr.bf16.mxu1 %v3123_v39 }
 0x1a5   :  { %1244 = vmatprep.mubr.bf16.mxu0 %v3928_v27  ;;  %1287 = vmatprep.mubr.bf16.mxu1 %v3928_v27 }
 0x1a7   :  { %1215 = vmatpush1.bf16.msra.mxu0 %v3127_v40  ;;  %1258 = vmatpush1.bf16.msra.mxu1 %v3134_v42 }
 0x1a8   :  { %1216 = vmatprep.subr.bf16.mxu0 %v3131_v41  ;;  %1259 = vmatprep.subr.bf16.mxu1 %v3143_v46 }
 0x1ab   :  { %1217 = vmatpush1.bf16.msra.mxu0 %v3138_v44  ;;  %1260 = vmatpush1.bf16.msra.mxu1 %v3146_v47 }
 0x1ac   :  { %1218 = vmatprep.subr.bf16.mxu0 %v3140_v45  ;;  %1261 = vmatprep.subr.bf16.mxu1 %v3148_v48 }
 0x1af   :  { %1219 = vmatpush1.bf16.msra.mxu0 %v3153_v49  ;;  %1262 = vmatpush1.bf16.msra.mxu1 %v3160_v51 }
 0x1b0   :  { %1220 = vmatprep.subr.bf16.mxu0 %v3155_v50  ;;  %1263 = vmatprep.subr.bf16.mxu1 %v3166_v54 }
 0x1b3   :  { %1221 = vmatpush1.bf16.msra.mxu0 %v3163_v53  ;;  %1264 = vmatpush1.bf16.msra.mxu1 %v3172_v56 }
 0x1b4   :  { %1222 = vmatprep.subr.bf16.mxu0 %v3169_v55  ;;  %1265 = vmatprep.subr.bf16.mxu1 %v3174_v57 }
 0x1b7   :  { %1223 = vmatpush1.bf16.msra.mxu0 %v3179_v58  ;;  %1266 = vmatpush1.bf16.msra.mxu1 %v3186_v60 }
 0x1b8   :  { %1224 = vmatprep.subr.bf16.mxu0 %v3183_v59  ;;  %1267 = vmatprep.subr.bf16.mxu1 %v3192_v63 }
 0x1bb   :  { %1225 = vmatpush1.bf16.msra.mxu0 %v3190_v62  ;;  %1268 = vmatpush1.bf16.msra.mxu1 %v3198_v2 }
 0x1bc   :  { %1226 = vmatprep.subr.bf16.mxu0 %v3196_v1  ;;  %1269 = vmatprep.subr.bf16.mxu1 %v3200_v3 }
 0x1bf   :  { %1227 = vmatpush1.bf16.msra.mxu0 %v3206_v4  ;;  %1270 = vmatpush1.bf16.msra.mxu1 %v3210_v5 }
 0x1c0   :  { %1376 = vmatprep.subr.bf16.mxu0 %v3111_v33  ;;  %1419 = vmatprep.subr.bf16.mxu1 %v3113_v34 }
 0x262   :  { %v1082_v35 = vpop.f32.mrf.mxu0  ;;  %v1125_v29 = vpop.f32.mrf.mxu1 }
 0x263   :  { %v1134_v23 = vadd.f32 %v1082_v35, %v3287_v43 }
 0x264   :  { %v1084_v61 = vpop.f32.mrf.mxu0  ;;  %v1127_v25 = vpop.f32.mrf.mxu1 }
 0x265   :  { %v2330_v10 = vmul.f32 -1.442695, %v1134_v23  ;;  %v1135_v14 = vadd.f32 %v1084_v61, %v3293_v7  ;;  %v1137_v43 = vadd.f32 %v1127_v25, %v3296_v8  ;;  %v1136_v7 = vadd.f32 %v1125_v29, %v3929_v20 }
 0x266   :  { %v1086_v17 = vpop.f32.mrf.mxu0  ;;  %v1129_v34 = vpop.f32.mrf.mxu1 }
 0x267   :  { %2593 = vpow2.f32 %v2330_v10  ;;  %v2332_v13 = vmul.f32 -1.442695, %v1135_v14  ;;  %v1138_v22 = vadd.f32 %v1086_v17, %v3299_v11  ;;  %v2334_v0 = vmul.f32 -1.442695, %v1137_v43 }
 0x268   :  { %v1088_v28 = vpop.f32.mrf.mxu0  ;;  %v1131_v12 = vpop.f32.mrf.mxu1  ;;  %v1140_v11 = vadd.f32 %v1129_v34, %v3931_v18 }
 0x269   :  { %2595 = vpow2.f32 %v2332_v13  ;;  %v2331_v30 = vmul.f32 -1.442695, %v1138_v22  ;;  %v1139_v33 = vadd.f32 %v1088_v28, %v3305_v19  ;;  %v1141_v24 = vadd.f32 %v1131_v12, %v3930_v52 }
 0x26b   :  { %2597 = vpow2.f32 %v2331_v30  ;;  %v2333_v26 = vmul.f32 -1.442695, %v1139_v33  ;;  %v2335_v19 = vmul.f32 -1.442695, %v1141_v24 }
 0x26d   :  { %2599 = vpow2.f32 %v2333_v26 }
 0x26e   :  { %2601 = vtanh.f32 %v1136_v7 }
 0x26f   :  { %2603 = vpow2.f32 %v2334_v0 }
 0x274   :  { %v2594_v21 = vpop.eup %2593 }
 0x275   :  { %v1148_v31 = vadd.f32 1.0, %v2594_v21 }
 0x276   :  { %v2596_v6 = vpop.eup %2595 }
 0x277   :  { %2605 = vrcp.f32 %v1148_v31  ;;  %v1160_v16 = vadd.f32 1.0, %v2596_v6 }
 0x278   :  { %v2598_v15 = vpop.eup %2597  ;;  %2607 = vtanh.f32 %v1140_v11 }
 0x279   :  { %2609 = vrcp.f32 %v1160_v16  ;;  %v1149_v8 = vadd.f32 1.0, %v2598_v15 }
 0x27a   :  { %v2600_v35 = vpop.eup %2599  ;;  %2611 = vpow2.f32 %v2335_v19 }
 0x27b   :  { %2613 = vrcp.f32 %v1149_v8  ;;  %v1161_v23 = vadd.f32 1.0, %v2600_v35  ;;  %v2602_v29 = vpop.eup %2601 }
 0x27c   :  { %v2604_v61 = vpop.eup %2603 }
 0x27d   :  { %2615 = vrcp.f32 %v1161_v23  ;;  %v1174_v30 = vadd.f32 1.0, %v2604_v61 }
 0x27f   :  { %2617 = vrcp.f32 %v1174_v30 }
 0x284   :  { %v2606_v10 = vpop.eup %2605 }
 0x285   :  { %v2608_v14 = vpop.eup %2607  ;;  %v1182_v17 = vmul.f32 %v2606_v10, %v2602_v29 }
 0x286   :  { %v2610_v13 = vpop.eup %2609 }
 0x287   :  { %v2612_v25 = vpop.eup %2611  ;;  %v1180_v22 = vmul.f32 %v2610_v13, %v3470_v32 }
 0x288   :  { %v2614_v28 = vpop.eup %2613  ;;  %v1175_v43 = vadd.f32 1.0, %v2612_v25 }
 0x289   :  { %v3519_v33 = vadd.f32 %v1182_v17, %v1180_v22  ;;  %v1183_v34 = vmul.f32 %v2614_v28, %v2608_v14 }
 0x28a   :  { %v2616_v26 = vpop.eup %2615 }
 0x28b   :  { %v1181_v12 = vmul.f32 %v2616_v26, %v3472_v9  ;;  %2619 = vtanh.f32 %v3519_v33  ;;  %v3939_v9 = vld [vmem:[#allocation31_spill] sm:$0xff] }
 0x28c   :  { %2621 = vrcp.f32 %v1175_v43  ;;  %v2618_v7 = vpop.eup %2617 }
 0x28d   :  { %v3522_v20 = vadd.f32 %v1183_v34, %v1181_v12 }
 0x28f   :  { %2623 = vtanh.f32 %v3522_v20 }
 0x298   :  { %v2620_v0 = vpop.eup %2619 }
 0x299   :  { %v2622_v32 = vpop.eup %2621  ;;  %v1188_v24 = vmul.f32 %v2620_v0, %v2618_v7 }
 0x29c   :  { %v2624_v52 = vpop.eup %2623 }
 0x29d   :  { %v1189_v21 = vmul.f32 %v2624_v52, %v2622_v32 }
 0x29f   :  { %v1190_v18 = vpack.c.bf16 %v1189_v21, %v1188_v24 }
 0x2a1   :  { %2411 = vst [vmem:[#allocation14 + $0x8] sm:$0xff] %v1190_v18   ;;  %1245 = vmatmul.mubr.bf16.vlgmr.msra.gmra.mxu0 %v1190_v18  ;;  %1288 = vmatmul.mubr.bf16.vlgmr.msra.gmra.mxu1 %v1190_v18 }
 0x2a2   :  { %1377 = vmatpush1.bf16.msra.mxu0 %v3115_v36  ;;  %1420 = vmatpush1.bf16.msra.mxu1 %v3121_v38  ;;  %v3558_v36 = vld [vmem:[#allocation10 + $0xe4] ss:$16 sps:$4 sm:$0xff]  }
 0x2a3   :  { %1378 = vmatprep.subr.bf16.mxu0 %v3118_v37  ;;  %1421 = vmatprep.subr.bf16.mxu1 %v3123_v39  ;;  %v3561_v37 = vld [vmem:[#allocation10 + $0xec] ss:$16 sps:$4 sm:$0xff]  }
 0x2a4   :  { %1408 = vmatprep.mubr.bf16.mxu0 %v3928_v27  ;;  %1451 = vmatprep.mubr.bf16.mxu1 %v3928_v27  ;;  %v3932_v39 = vld [vmem:[#allocation26_spill] sm:$0xff] }
 0x2a6   :  { %1379 = vmatpush1.bf16.msra.mxu0 %v3127_v40  ;;  %1422 = vmatpush1.bf16.msra.mxu1 %v3134_v42 }
 0x2a7   :  { %1380 = vmatprep.subr.bf16.mxu0 %v3131_v41  ;;  %1423 = vmatprep.subr.bf16.mxu1 %v3143_v46 }
 0x2aa   :  { %1381 = vmatpush1.bf16.msra.mxu0 %v3138_v44  ;;  %1424 = vmatpush1.bf16.msra.mxu1 %v3146_v47 }
 0x2ab   :  { %1382 = vmatprep.subr.bf16.mxu0 %v3140_v45  ;;  %1425 = vmatprep.subr.bf16.mxu1 %v3148_v48  ;;  %v3933_v45 = vld [vmem:[#allocation28_spill] sm:$0xff] }
 0x2ae   :  { %1383 = vmatpush1.bf16.msra.mxu0 %v3153_v49  ;;  %1426 = vmatpush1.bf16.msra.mxu1 %v3160_v51 }
 0x2af   :  { %1384 = vmatprep.subr.bf16.mxu0 %v3155_v50  ;;  %1427 = vmatprep.subr.bf16.mxu1 %v3166_v54  ;;  %v3934_v50 = vld [vmem:[#allocation30_spill] sm:$0xff] }
 0x2b2   :  { %1385 = vmatpush1.bf16.msra.mxu0 %v3163_v53  ;;  %1428 = vmatpush1.bf16.msra.mxu1 %v3172_v56 }
 0x2b3   :  { %1386 = vmatprep.subr.bf16.mxu0 %v3169_v55  ;;  %1429 = vmatprep.subr.bf16.mxu1 %v3174_v57  ;;  %v3935_v55 = vld [vmem:[#allocation32_spill] sm:$0xff] }
 0x2b6   :  { %1387 = vmatpush1.bf16.msra.mxu0 %v3179_v58  ;;  %1430 = vmatpush1.bf16.msra.mxu1 %v3186_v60 }
 0x2b7   :  { %1388 = vmatprep.subr.bf16.mxu0 %v3183_v59  ;;  %1431 = vmatprep.subr.bf16.mxu1 %v3192_v63  ;;  %v3936_v59 = vld [vmem:[#allocation29_spill] sm:$0xff]  ;;  %v3937_v63 = vld [vmem:[#allocation27_spill] sm:$0xff] }
 0x2ba   :  { %1389 = vmatpush1.bf16.msra.mxu0 %v3190_v62  ;;  %1432 = vmatpush1.bf16.msra.mxu1 %v3198_v2 }
 0x2bb   :  { %1390 = vmatprep.subr.bf16.mxu0 %v3196_v1  ;;  %1433 = vmatprep.subr.bf16.mxu1 %v3200_v3  ;;  %v3938_v3 = vld [vmem:[#allocation33_spill] sm:$0xff] }
 0x2be   :  { %1391 = vmatpush1.bf16.msra.mxu0 %v3206_v4  ;;  %1434 = vmatpush1.bf16.msra.mxu1 %v3210_v5 }
 0x2bf   :  { %1540 = vmatprep.subr.bf16.mxu0 %v3558_v36  ;;  %1583 = vmatprep.subr.bf16.mxu1 %v3561_v37 }
 0x361   :  { %v1246_v38 = vpop.f32.mrf.mxu0  ;;  %v1289_v41 = vpop.f32.mrf.mxu1 }
 0x362   :  { %v1298_v40 = vadd.f32 %v1246_v38, %v3932_v39  ;;  %v1300_v1 = vadd.f32 %v1289_v41, %v3937_v63  ;;  %v3580_v39 = vld [vmem:[#allocation10 + $0xe0] ss:$16 sps:$4 sm:$0xff]   ;;  %v3589_v41 = vld [vmem:[#allocation10 + $0xcc] ss:$16 sps:$4 sm:$0xff]   ;;  %v3648_v63 = vld [vmem:[#allocation10 + $0x24] ss:$16 sps:$4 sm:$0xff]  }
 0x363   :  { %v1248_v42 = vpop.f32.mrf.mxu0  ;;  %v1291_v49 = vpop.f32.mrf.mxu1 }
 0x364   :  { %v2338_v44 = vmul.f32 -1.442695, %v1298_v40  ;;  %v1299_v46 = vadd.f32 %v1248_v42, %v3933_v45  ;;  %v1301_v60 = vadd.f32 %v1291_v49, %v3936_v59  ;;  %v3586_v40 = vld [vmem:[#allocation10 + $0xc4] ss:$16 sps:$4 sm:$0xff]   ;;  %v3594_v42 = vld [vmem:[#allocation10 + $0xc0] ss:$16 sps:$4 sm:$0xff]  }
 0x365   :  { %v1250_v47 = vpop.f32.mrf.mxu0  ;;  %v1293_v57 = vpop.f32.mrf.mxu1  ;;  %v3600_v45 = vld [vmem:[#allocation10 + $0xa4] ss:$16 sps:$4 sm:$0xff]   ;;  %v3639_v59 = vld [vmem:[#allocation10 + $0x4c] ss:$16 sps:$4 sm:$0xff]  }
 0x366   :  { %2625 = vpow2.f32 %v2338_v44  ;;  %v2340_v48 = vmul.f32 -1.442695, %v1299_v46  ;;  %v1302_v51 = vadd.f32 %v1250_v47, %v3934_v50  ;;  %v2342_v2 = vmul.f32 -1.442695, %v1301_v60  ;;  %v3597_v44 = vld [vmem:[#allocation10 + $0xc8] ss:$16 sps:$4 sm:$0xff]  }
 0x367   :  { %v1252_v53 = vpop.f32.mrf.mxu0  ;;  %v1295_v62 = vpop.f32.mrf.mxu1  ;;  %v1304_v11 = vadd.f32 %v1293_v57, %v3939_v9  ;;  %v3603_v46 = vld [vmem:[#allocation10 + $0xac] ss:$16 sps:$4 sm:$0xff]   ;;  %v3606_v47 = vld [vmem:[#allocation10 + $0xa0] ss:$16 sps:$4 sm:$0xff]   ;;  %v3612_v49 = vld [vmem:[#allocation10 + $0x84] ss:$16 sps:$4 sm:$0xff]  }
 0x368   :  { %2627 = vpow2.f32 %v2340_v48  ;;  %v2339_v54 = vmul.f32 -1.442695, %v1302_v51  ;;  %v1303_v56 = vadd.f32 %v1252_v53, %v3935_v55  ;;  %v1305_v4 = vadd.f32 %v1295_v62, %v3938_v3  ;;  %v3609_v48 = vld [vmem:[#allocation10 + $0xa8] ss:$16 sps:$4 sm:$0xff]   ;;  %v3615_v50 = vld [vmem:[#allocation10 + $0x8c] ss:$16 sps:$4 sm:$0xff]  }
 0x369   :  { %v3618_v51 = vld [vmem:[#allocation10 + $0x80] ss:$16 sps:$4 sm:$0xff]   ;;  %v3621_v53 = vld [vmem:[#allocation10 + $0x88] ss:$16 sps:$4 sm:$0xff]   ;;  %v3627_v55 = vld [vmem:[#allocation10 + $0x6c] ss:$16 sps:$4 sm:$0xff]  }
 0x36a   :  { %2629 = vpow2.f32 %v2339_v54  ;;  %v2341_v58 = vmul.f32 -1.442695, %v1303_v56  ;;  %v2343_v19 = vmul.f32 -1.442695, %v1305_v4  ;;  %v3624_v54 = vld [vmem:[#allocation10 + $0x64] ss:$16 sps:$4 sm:$0xff]  }
 0x36b   :  { %v3630_v56 = vld [vmem:[#allocation10 + $0x60] ss:$16 sps:$4 sm:$0xff]   ;;  %v3633_v57 = vld [vmem:[#allocation10 + $0x68] ss:$16 sps:$4 sm:$0xff]   ;;  %v3660_v4 = vld [vmem:[#allocation10 + $0x4] ss:$16 sps:$4 sm:$0xff]  }
 0x36c   :  { %2631 = vpow2.f32 %v2341_v58  ;;  %v3636_v58 = vld [vmem:[#allocation10 + $0x44] ss:$16 sps:$4 sm:$0xff]   ;;  %v3642_v60 = vld [vmem:[#allocation10 + $0x40] ss:$16 sps:$4 sm:$0xff]   ;;  %v3645_v62 = vld [vmem:[#allocation10 + $0x48] ss:$16 sps:$4 sm:$0xff]  }
 0x36d   :  { %2633 = vtanh.f32 %v1300_v1  ;;  %v3651_v1 = vld [vmem:[#allocation10 + $0x2c] ss:$16 sps:$4 sm:$0xff]   ;;  %v3657_v3 = vld [vmem:[#allocation10 + $0x28] ss:$16 sps:$4 sm:$0xff]   ;;  %v3666_v9 = vld [vmem:[#allocation10] ss:$16 sps:$4 sm:$0xff]  }
 0x36e   :  { %2635 = vpow2.f32 %v2342_v2  ;;  %v3654_v2 = vld [vmem:[#allocation10 + $0x20] ss:$16 sps:$4 sm:$0xff]  }
 0x373   :  { %v2626_v5 = vpop.eup %2625 }
 0x374   :  { %v1312_v31 = vadd.f32 1.0, %v2626_v5  ;;  %v3663_v5 = vld [vmem:[#allocation10 + $0xc] ss:$16 sps:$4 sm:$0xff]  }
 0x375   :  { %v2628_v6 = vpop.eup %2627 }
 0x376   :  { %2637 = vrcp.f32 %v1312_v31  ;;  %v1324_v16 = vadd.f32 1.0, %v2628_v6  ;;  %v3940_v6 = vld [vmem:[#allocation34_spill] sm:$0xff] }
 0x377   :  { %v2630_v15 = vpop.eup %2629  ;;  %2639 = vtanh.f32 %v1304_v11  ;;  %v3669_v11 = vld [vmem:[#allocation10 + $0x8] ss:$16 sps:$4 sm:$0xff]  }
 0x378   :  { %2641 = vrcp.f32 %v1324_v16  ;;  %v1313_v8 = vadd.f32 1.0, %v2630_v15 }
 0x379   :  { %v2632_v35 = vpop.eup %2631  ;;  %2643 = vpow2.f32 %v2343_v19 }
 0x37a   :  { %2645 = vrcp.f32 %v1313_v8  ;;  %v1325_v23 = vadd.f32 1.0, %v2632_v35  ;;  %v2634_v29 = vpop.eup %2633  ;;  %v3941_v35 = vld [vmem:[#allocation36_spill] sm:$0xff] }
 0x37b   :  { %v2636_v61 = vpop.eup %2635 }
 0x37c   :  { %2647 = vrcp.f32 %v1325_v23  ;;  %v1338_v30 = vadd.f32 1.0, %v2636_v61 }
 0x37e   :  { %2649 = vrcp.f32 %v1338_v30 }
 0x383   :  { %v2638_v10 = vpop.eup %2637 }
 0x384   :  { %v2640_v14 = vpop.eup %2639  ;;  %v1346_v17 = vmul.f32 %v2638_v10, %v2634_v29 }
 0x385   :  { %v2642_v13 = vpop.eup %2641 }
 0x386   :  { %v2644_v25 = vpop.eup %2643  ;;  %v1344_v22 = vmul.f32 %v2642_v13, %v3519_v33 }
 0x387   :  { %v2646_v28 = vpop.eup %2645  ;;  %v1339_v12 = vadd.f32 1.0, %v2644_v25 }
 0x388   :  { %v3573_v34 = vadd.f32 %v1346_v17, %v1344_v22  ;;  %v1347_v26 = vmul.f32 %v2646_v28, %v2640_v14  ;;  %v3942_v14 = vld [vmem:[#allocation38_spill] sm:$0xff]  ;;  %v3943_v22 = vld [vmem:[#allocation40_spill] sm:$0xff] }
 0x389   :  { %v2648_v43 = vpop.eup %2647 }
 0x38a   :  { %v1345_v7 = vmul.f32 %v2648_v43, %v3522_v20  ;;  %2651 = vtanh.f32 %v3573_v34  ;;  %v3583_v20 = vld [vmem:[#allocation10 + $0xe8] ss:$16 sps:$4 sm:$0xff]   ;;  %v3944_v43 = vld [vmem:[#allocation37_spill] sm:$0xff] }
 0x38b   :  { %2653 = vrcp.f32 %v1339_v12  ;;  %v2650_v32 = vpop.eup %2649 }
 0x38c   :  { %v3576_v0 = vadd.f32 %v1347_v26, %v1345_v7 }
 0x38e   :  { %2655 = vtanh.f32 %v3576_v0 }
 0x397   :  { %v2652_v52 = vpop.eup %2651 }
 0x398   :  { %v2654_v33 = vpop.eup %2653  ;;  %v1352_v21 = vmul.f32 %v2652_v52, %v2650_v32  ;;  %v3945_v32 = vld [vmem:[#allocation35_spill] sm:$0xff] }
 0x39b   :  { %v2656_v24 = vpop.eup %2655 }
 0x39c   :  { %v1353_v18 = vmul.f32 %v2656_v24, %v2654_v33  ;;  %v3946_v24 = vld [vmem:[#allocation41_spill] sm:$0xff] }
 0x39e   :  { %v1354_v38 = vpack.c.bf16 %v1353_v18, %v1352_v21 }
 0x3a0   :  { %2416 = vst [vmem:[#allocation14 + $0x10] sm:$0xff] %v1354_v38   ;;  %1409 = vmatmul.mubr.bf16.vlgmr.msra.gmra.mxu0 %v1354_v38  ;;  %1452 = vmatmul.mubr.bf16.vlgmr.msra.gmra.mxu1 %v1354_v38  ;;  %v3947_v38 = vld [vmem:[#allocation39_spill] sm:$0xff] }
 0x3a1   :  { %1541 = vmatpush1.bf16.msra.mxu0 %v3580_v39  ;;  %1584 = vmatpush1.bf16.msra.mxu1 %v3583_v20 }
 0x3a2   :  { %1542 = vmatprep.subr.bf16.mxu0 %v3586_v40  ;;  %1585 = vmatprep.subr.bf16.mxu1 %v3589_v41 }
 0x3a3   :  { %1572 = vmatprep.mubr.bf16.mxu0 %v3928_v27  ;;  %1615 = vmatprep.mubr.bf16.mxu1 %v3928_v27 }
 0x3a5   :  { %1543 = vmatpush1.bf16.msra.mxu0 %v3594_v42  ;;  %1586 = vmatpush1.bf16.msra.mxu1 %v3597_v44 }
 0x3a6   :  { %1544 = vmatprep.subr.bf16.mxu0 %v3600_v45  ;;  %1587 = vmatprep.subr.bf16.mxu1 %v3603_v46 }
 0x3a9   :  { %1545 = vmatpush1.bf16.msra.mxu0 %v3606_v47  ;;  %1588 = vmatpush1.bf16.msra.mxu1 %v3609_v48 }
 0x3aa   :  { %1546 = vmatprep.subr.bf16.mxu0 %v3612_v49  ;;  %1589 = vmatprep.subr.bf16.mxu1 %v3615_v50 }
 0x3ad   :  { %1547 = vmatpush1.bf16.msra.mxu0 %v3618_v51  ;;  %1590 = vmatpush1.bf16.msra.mxu1 %v3621_v53 }
 0x3ae   :  { %1548 = vmatprep.subr.bf16.mxu0 %v3624_v54  ;;  %1591 = vmatprep.subr.bf16.mxu1 %v3627_v55 }
 0x3b1   :  { %1549 = vmatpush1.bf16.msra.mxu0 %v3630_v56  ;;  %1592 = vmatpush1.bf16.msra.mxu1 %v3633_v57 }
 0x3b2   :  { %1550 = vmatprep.subr.bf16.mxu0 %v3636_v58  ;;  %1593 = vmatprep.subr.bf16.mxu1 %v3639_v59 }
 0x3b5   :  { %1551 = vmatpush1.bf16.msra.mxu0 %v3642_v60  ;;  %1594 = vmatpush1.bf16.msra.mxu1 %v3645_v62 }
 0x3b6   :  { %1552 = vmatprep.subr.bf16.mxu0 %v3648_v63  ;;  %1595 = vmatprep.subr.bf16.mxu1 %v3651_v1 }
 0x3b9   :  { %1553 = vmatpush1.bf16.msra.mxu0 %v3654_v2  ;;  %1596 = vmatpush1.bf16.msra.mxu1 %v3657_v3 }
 0x3ba   :  { %1554 = vmatprep.subr.bf16.mxu0 %v3660_v4  ;;  %1597 = vmatprep.subr.bf16.mxu1 %v3663_v5 }
 0x3bd   :  { %1555 = vmatpush1.bf16.msra.mxu0 %v3666_v9  ;;  %1598 = vmatpush1.bf16.msra.mxu1 %v3669_v11 }
 0x3be   :  { %1704 = vmatprep.subr.bf16.mxu0 %v3558_v36  ;;  %1747 = vmatprep.subr.bf16.mxu1 %v3561_v37 }
 0x460   :  { %v1410_v31 = vpop.f32.mrf.mxu0  ;;  %v1453_v16 = vpop.f32.mrf.mxu1 }
 0x461   :  { %v1462_v19 = vadd.f32 %v1410_v31, %v3940_v6  ;;  %v1464_v52 = vadd.f32 %v1453_v16, %v3945_v32 }
 0x462   :  { %v1412_v15 = vpop.f32.mrf.mxu0  ;;  %v1455_v10 = vpop.f32.mrf.mxu1 }
 0x463   :  { %v2346_v8 = vmul.f32 -1.442695, %v1462_v19  ;;  %v1463_v23 = vadd.f32 %v1412_v15, %v3941_v35  ;;  %v1465_v12 = vadd.f32 %v1455_v10, %v3944_v43 }
 0x464   :  { %v1414_v29 = vpop.f32.mrf.mxu0  ;;  %v1457_v30 = vpop.f32.mrf.mxu1 }
 0x465   :  { %2657 = vpow2.f32 %v2346_v8  ;;  %v2348_v61 = vmul.f32 -1.442695, %v1463_v23  ;;  %v1466_v17 = vadd.f32 %v1414_v29, %v3942_v14  ;;  %v2350_v33 = vmul.f32 -1.442695, %v1465_v12 }
 0x466   :  { %v1416_v13 = vpop.f32.mrf.mxu0  ;;  %v1459_v7 = vpop.f32.mrf.mxu1  ;;  %v1468_v31 = vadd.f32 %v1457_v30, %v3947_v38 }
 0x467   :  { %2659 = vpow2.f32 %v2348_v61  ;;  %v2347_v25 = vmul.f32 -1.442695, %v1466_v17  ;;  %v1467_v28 = vadd.f32 %v1416_v13, %v3943_v22  ;;  %v1469_v21 = vadd.f32 %v1459_v7, %v3946_v24 }
 0x469   :  { %2661 = vpow2.f32 %v2347_v25  ;;  %v2349_v26 = vmul.f32 -1.442695, %v1467_v28  ;;  %v2351_v15 = vmul.f32 -1.442695, %v1469_v21 }
 0x46b   :  { %2663 = vpow2.f32 %v2349_v26 }
 0x46c   :  { %2665 = vtanh.f32 %v1464_v52 }
 0x46d   :  { %2667 = vpow2.f32 %v2350_v33 }
 0x472   :  { %v2658_v18 = vpop.eup %2657 }
 0x473   :  { %v1476_v6 = vadd.f32 1.0, %v2658_v18 }
 0x474   :  { %v2660_v19 = vpop.eup %2659 }
 0x475   :  { %2669 = vrcp.f32 %v1476_v6  ;;  %v1488_v8 = vadd.f32 1.0, %v2660_v19  ;;  %v3948_v19 = vld [vmem:[#allocation42_spill] sm:$0xff] }
 0x476   :  { %v2662_v35 = vpop.eup %2661  ;;  %2671 = vtanh.f32 %v1468_v31 }
 0x477   :  { %2673 = vrcp.f32 %v1488_v8  ;;  %v1477_v23 = vadd.f32 1.0, %v2662_v35 }
 0x478   :  { %v2664_v29 = vpop.eup %2663  ;;  %2675 = vpow2.f32 %v2351_v15 }
 0x479   :  { %2677 = vrcp.f32 %v1477_v23  ;;  %v1489_v16 = vadd.f32 1.0, %v2664_v29  ;;  %v2666_v61 = vpop.eup %2665  ;;  %v3949_v29 = vld [vmem:[#allocation44_spill] sm:$0xff] }
 0x47a   :  { %v2668_v10 = vpop.eup %2667 }
 0x47b   :  { %2679 = vrcp.f32 %v1489_v16  ;;  %v1502_v26 = vadd.f32 1.0, %v2668_v10 }
 0x47d   :  { %2681 = vrcp.f32 %v1502_v26 }
 0x482   :  { %v2670_v14 = vpop.eup %2669 }
 0x483   :  { %v2672_v17 = vpop.eup %2671  ;;  %v1510_v13 = vmul.f32 %v2670_v14, %v2666_v61 }
 0x484   :  { %v2674_v25 = vpop.eup %2673 }
 0x485   :  { %v2676_v22 = vpop.eup %2675  ;;  %v1508_v28 = vmul.f32 %v2674_v25, %v3573_v34 }
 0x486   :  { %v2678_v30 = vpop.eup %2677  ;;  %v1503_v32 = vadd.f32 1.0, %v2676_v22 }
 0x487   :  { %v3683_v43 = vadd.f32 %v1510_v13, %v1508_v28  ;;  %v1511_v12 = vmul.f32 %v2678_v30, %v2672_v17  ;;  %v3950_v17 = vld [vmem:[#allocation46_spill] sm:$0xff]  ;;  %v3951_v28 = vld [vmem:[#allocation48_spill] sm:$0xff] }
 0x488   :  { %v2680_v7 = vpop.eup %2679 }
 0x489   :  { %v1509_v52 = vmul.f32 %v2680_v7, %v3576_v0  ;;  %2683 = vtanh.f32 %v3683_v43  ;;  %v3952_v7 = vld [vmem:[#allocation45_spill] sm:$0xff] }
 0x48a   :  { %2685 = vrcp.f32 %v1503_v32  ;;  %v2682_v24 = vpop.eup %2681 }
 0x48b   :  { %v3686_v33 = vadd.f32 %v1511_v12, %v1509_v52 }
 0x48d   :  { %2687 = vtanh.f32 %v3686_v33 }
 0x496   :  { %v2684_v21 = vpop.eup %2683 }
 0x497   :  { %v2686_v34 = vpop.eup %2685  ;;  %v1516_v38 = vmul.f32 %v2684_v21, %v2682_v24  ;;  %v3953_v24 = vld [vmem:[#allocation43_spill] sm:$0xff] }
 0x49a   :  { %v2688_v18 = vpop.eup %2687 }
 0x49b   :  { %v1517_v31 = vmul.f32 %v2688_v18, %v2686_v34  ;;  %v3954_v18 = vld [vmem:[#allocation49_spill] sm:$0xff] }
 0x49d   :  { %v1518_v6 = vpack.c.bf16 %v1517_v31, %v1516_v38 }
 0x49f   :  { %2421 = vst [vmem:[#allocation14 + $0x18] sm:$0xff] %v1518_v6   ;;  %1573 = vmatmul.mubr.bf16.vlgmr.msra.gmra.mxu0 %v1518_v6  ;;  %1616 = vmatmul.mubr.bf16.vlgmr.msra.gmra.mxu1 %v1518_v6  ;;  %v3955_v6 = vld [vmem:[#allocation47_spill] sm:$0xff] }
 0x4a0   :  { %1705 = vmatpush1.bf16.msra.mxu0 %v3580_v39  ;;  %1748 = vmatpush1.bf16.msra.mxu1 %v3583_v20 }
 0x4a1   :  { %1706 = vmatprep.subr.bf16.mxu0 %v3586_v40  ;;  %1749 = vmatprep.subr.bf16.mxu1 %v3589_v41 }
 0x4a2   :  { %1736 = vmatprep.mubr.bf16.mxu0 %v3928_v27  ;;  %1779 = vmatprep.mubr.bf16.mxu1 %v3928_v27 }
 0x4a4   :  { %1707 = vmatpush1.bf16.msra.mxu0 %v3594_v42  ;;  %1750 = vmatpush1.bf16.msra.mxu1 %v3597_v44 }
 0x4a5   :  { %1708 = vmatprep.subr.bf16.mxu0 %v3600_v45  ;;  %1751 = vmatprep.subr.bf16.mxu1 %v3603_v46 }
 0x4a8   :  { %1709 = vmatpush1.bf16.msra.mxu0 %v3606_v47  ;;  %1752 = vmatpush1.bf16.msra.mxu1 %v3609_v48 }
 0x4a9   :  { %1710 = vmatprep.subr.bf16.mxu0 %v3612_v49  ;;  %1753 = vmatprep.subr.bf16.mxu1 %v3615_v50 }
 0x4ac   :  { %1711 = vmatpush1.bf16.msra.mxu0 %v3618_v51  ;;  %1754 = vmatpush1.bf16.msra.mxu1 %v3621_v53 }
 0x4ad   :  { %1712 = vmatprep.subr.bf16.mxu0 %v3624_v54  ;;  %1755 = vmatprep.subr.bf16.mxu1 %v3627_v55 }
 0x4b0   :  { %1713 = vmatpush1.bf16.msra.mxu0 %v3630_v56  ;;  %1756 = vmatpush1.bf16.msra.mxu1 %v3633_v57 }
 0x4b1   :  { %1714 = vmatprep.subr.bf16.mxu0 %v3636_v58  ;;  %1757 = vmatprep.subr.bf16.mxu1 %v3639_v59 }
 0x4b4   :  { %1715 = vmatpush1.bf16.msra.mxu0 %v3642_v60  ;;  %1758 = vmatpush1.bf16.msra.mxu1 %v3645_v62 }
 0x4b5   :  { %1716 = vmatprep.subr.bf16.mxu0 %v3648_v63  ;;  %1759 = vmatprep.subr.bf16.mxu1 %v3651_v1 }
 0x4b8   :  { %1717 = vmatpush1.bf16.msra.mxu0 %v3654_v2  ;;  %1760 = vmatpush1.bf16.msra.mxu1 %v3657_v3 }
 0x4b9   :  { %1718 = vmatprep.subr.bf16.mxu0 %v3660_v4  ;;  %1761 = vmatprep.subr.bf16.mxu1 %v3663_v5 }
 0x4bc   :  { %1719 = vmatpush1.bf16.msra.mxu0 %v3666_v9  ;;  %1762 = vmatpush1.bf16.msra.mxu1 %v3669_v11 }
 0x4bd   :  { %1868 = vmatprep.subr.bf16.mxu0 %v3558_v36  ;;  %1911 = vmatprep.subr.bf16.mxu1 %v3561_v37 }
 0x55f   :  { %v1574_v0 = vpop.f32.mrf.mxu0  ;;  %v1617_v8 = vpop.f32.mrf.mxu1 }
 0x560   :  { %v1626_v15 = vadd.f32 %v1574_v0, %v3948_v19  ;;  %v1628_v21 = vadd.f32 %v1617_v8, %v3953_v24 }
 0x561   :  { %v1576_v35 = vpop.f32.mrf.mxu0  ;;  %v1619_v14 = vpop.f32.mrf.mxu1 }
 0x562   :  { %v2354_v23 = vmul.f32 -1.442695, %v1626_v15  ;;  %v1627_v16 = vadd.f32 %v1576_v35, %v3949_v29  ;;  %v1629_v32 = vadd.f32 %v1619_v14, %v3952_v7 }
 0x563   :  { %v1578_v61 = vpop.f32.mrf.mxu0  ;;  %v1621_v26 = vpop.f32.mrf.mxu1 }
 0x564   :  { %2689 = vpow2.f32 %v2354_v23  ;;  %v2356_v10 = vmul.f32 -1.442695, %v1627_v16  ;;  %v1630_v13 = vadd.f32 %v1578_v61, %v3950_v17  ;;  %v2358_v34 = vmul.f32 -1.442695, %v1629_v32 }
 0x565   :  { %v1580_v25 = vpop.f32.mrf.mxu0  ;;  %v1623_v52 = vpop.f32.mrf.mxu1  ;;  %v1632_v0 = vadd.f32 %v1621_v26, %v3955_v6 }
 0x566   :  { %2691 = vpow2.f32 %v2356_v10  ;;  %v2355_v22 = vmul.f32 -1.442695, %v1630_v13  ;;  %v1631_v30 = vadd.f32 %v1580_v25, %v3951_v28  ;;  %v1633_v38 = vadd.f32 %v1623_v52, %v3954_v18 }
 0x568   :  { %2693 = vpow2.f32 %v2355_v22  ;;  %v2357_v12 = vmul.f32 -1.442695, %v1631_v30  ;;  %v2359_v35 = vmul.f32 -1.442695, %v1633_v38 }
 0x56a   :  { %2695 = vpow2.f32 %v2357_v12 }
 0x56b   :  { %2697 = vtanh.f32 %v1628_v21 }
 0x56c   :  { %2699 = vpow2.f32 %v2358_v34 }
 0x571   :  { %v2690_v31 = vpop.eup %2689 }
 0x572   :  { %v1640_v19 = vadd.f32 1.0, %v2690_v31 }
 0x573   :  { %v2692_v15 = vpop.eup %2691 }
 0x574   :  { %2701 = vrcp.f32 %v1640_v19  ;;  %v1652_v23 = vadd.f32 1.0, %v2692_v15  ;;  %v3956_v15 = vld [vmem:[#allocation50_spill] sm:$0xff] }
 0x575   :  { %v2694_v29 = vpop.eup %2693  ;;  %2703 = vtanh.f32 %v1632_v0 }
 0x576   :  { %2705 = vrcp.f32 %v1652_v23  ;;  %v1641_v16 = vadd.f32 1.0, %v2694_v29 }
 0x577   :  { %v2696_v61 = vpop.eup %2695  ;;  %2707 = vpow2.f32 %v2359_v35 }
 0x578   :  { %2709 = vrcp.f32 %v1641_v16  ;;  %v1653_v8 = vadd.f32 1.0, %v2696_v61  ;;  %v2698_v10 = vpop.eup %2697  ;;  %v3957_v61 = vld [vmem:[#allocation52_spill] sm:$0xff] }
 0x579   :  { %v2700_v14 = vpop.eup %2699 }
 0x57a   :  { %2711 = vrcp.f32 %v1653_v8  ;;  %v1666_v12 = vadd.f32 1.0, %v2700_v14 }
 0x57c   :  { %2713 = vrcp.f32 %v1666_v12  ;;  %v3960_v12 = vld [vmem:[#allocation53_spill] sm:$0xff] }
 0x581   :  { %v2702_v17 = vpop.eup %2701 }
 0x582   :  { %v2704_v13 = vpop.eup %2703  ;;  %v1674_v25 = vmul.f32 %v2702_v17, %v2698_v10 }
 0x583   :  { %v2706_v22 = vpop.eup %2705 }
 0x584   :  { %v2708_v28 = vpop.eup %2707  ;;  %v1672_v30 = vmul.f32 %v2706_v22, %v3683_v43 }
 0x585   :  { %v2710_v26 = vpop.eup %2709  ;;  %v1667_v24 = vadd.f32 1.0, %v2708_v28 }
 0x586   :  { %v3733_v7 = vadd.f32 %v1674_v25, %v1672_v30  ;;  %v1675_v32 = vmul.f32 %v2710_v26, %v2704_v13  ;;  %v3958_v13 = vld [vmem:[#allocation54_spill] sm:$0xff] }
 0x587   :  { %v2712_v52 = vpop.eup %2711 }
 0x588   :  { %v1673_v21 = vmul.f32 %v2712_v52, %v3686_v33  ;;  %2715 = vtanh.f32 %v3733_v7 }
 0x589   :  { %2717 = vrcp.f32 %v1667_v24  ;;  %v2714_v18 = vpop.eup %2713  ;;  %v3961_v24 = vld [vmem:[#allocation51_spill] sm:$0xff] }
 0x58a   :  { %v3736_v34 = vadd.f32 %v1675_v32, %v1673_v21 }
 0x58c   :  { %2719 = vtanh.f32 %v3736_v34 }
 0x595   :  { %v2716_v38 = vpop.eup %2715 }
 0x596   :  { %v2718_v43 = vpop.eup %2717  ;;  %v1680_v6 = vmul.f32 %v2716_v38, %v2714_v18  ;;  %v3962_v38 = vld [vmem:[#allocation57_spill] sm:$0xff] }
 0x599   :  { %v2720_v31 = vpop.eup %2719 }
 0x59a   :  { %v1681_v0 = vmul.f32 %v2720_v31, %v2718_v43 }
 0x59c   :  { %v1682_v19 = vpack.c.bf16 %v1681_v0, %v1680_v6  ;;  %v3963_v6 = vld [vmem:[#allocation55_spill] sm:$0xff] }
 0x59e   :  { %2426 = vst [vmem:[#allocation14 + $0x20] sm:$0xff] %v1682_v19   ;;  %1737 = vmatmul.mubr.bf16.vlgmr.msra.gmra.mxu0 %v1682_v19  ;;  %1780 = vmatmul.mubr.bf16.vlgmr.msra.gmra.mxu1 %v1682_v19 }
 0x59f   :  { %1869 = vmatpush1.bf16.msra.mxu0 %v3580_v39  ;;  %1912 = vmatpush1.bf16.msra.mxu1 %v3583_v20 }
 0x5a0   :  { %1870 = vmatprep.subr.bf16.mxu0 %v3586_v40  ;;  %1913 = vmatprep.subr.bf16.mxu1 %v3589_v41 }
 0x5a1   :  { %1900 = vmatprep.mubr.bf16.mxu0 %v3928_v27  ;;  %1943 = vmatprep.mubr.bf16.mxu1 %v3928_v27 }
 0x5a3   :  { %1871 = vmatpush1.bf16.msra.mxu0 %v3594_v42  ;;  %1914 = vmatpush1.bf16.msra.mxu1 %v3597_v44 }
 0x5a4   :  { %1872 = vmatprep.subr.bf16.mxu0 %v3600_v45  ;;  %1915 = vmatprep.subr.bf16.mxu1 %v3603_v46 }
 0x5a7   :  { %1873 = vmatpush1.bf16.msra.mxu0 %v3606_v47  ;;  %1916 = vmatpush1.bf16.msra.mxu1 %v3609_v48 }
 0x5a8   :  { %1874 = vmatprep.subr.bf16.mxu0 %v3612_v49  ;;  %1917 = vmatprep.subr.bf16.mxu1 %v3615_v50 }
 0x5ab   :  { %1875 = vmatpush1.bf16.msra.mxu0 %v3618_v51  ;;  %1918 = vmatpush1.bf16.msra.mxu1 %v3621_v53 }
 0x5ac   :  { %1876 = vmatprep.subr.bf16.mxu0 %v3624_v54  ;;  %1919 = vmatprep.subr.bf16.mxu1 %v3627_v55 }
 0x5af   :  { %1877 = vmatpush1.bf16.msra.mxu0 %v3630_v56  ;;  %1920 = vmatpush1.bf16.msra.mxu1 %v3633_v57 }
 0x5b0   :  { %1878 = vmatprep.subr.bf16.mxu0 %v3636_v58  ;;  %1921 = vmatprep.subr.bf16.mxu1 %v3639_v59 }
 0x5b3   :  { %1879 = vmatpush1.bf16.msra.mxu0 %v3642_v60  ;;  %1922 = vmatpush1.bf16.msra.mxu1 %v3645_v62 }
 0x5b4   :  { %1880 = vmatprep.subr.bf16.mxu0 %v3648_v63  ;;  %1923 = vmatprep.subr.bf16.mxu1 %v3651_v1 }
 0x5b7   :  { %1881 = vmatpush1.bf16.msra.mxu0 %v3654_v2  ;;  %1924 = vmatpush1.bf16.msra.mxu1 %v3657_v3 }
 0x5b8   :  { %1882 = vmatprep.subr.bf16.mxu0 %v3660_v4  ;;  %1925 = vmatprep.subr.bf16.mxu1 %v3663_v5 }
 0x5bb   :  { %1883 = vmatpush1.bf16.msra.mxu0 %v3666_v9  ;;  %1926 = vmatpush1.bf16.msra.mxu1 %v3669_v11 }
 0x5bc   :  { %2032 = vmatprep.subr.bf16.mxu0 %v3558_v36  ;;  %2075 = vmatprep.subr.bf16.mxu1 %v3561_v37  ;;  %v3959_v36 = vld [vmem:[#allocation56_spill] sm:$0xff] }
 0x65e   :  { %v1738_v33 = vpop.f32.mrf.mxu0  ;;  %v1781_v23 = vpop.f32.mrf.mxu1 }
 0x65f   :  { %v1790_v35 = vadd.f32 %v1738_v33, %v3956_v15  ;;  %v1792_v21 = vadd.f32 %v1781_v23, %v3961_v24 }
 0x660   :  { %v1740_v29 = vpop.f32.mrf.mxu0  ;;  %v1783_v17 = vpop.f32.mrf.mxu1 }
 0x661   :  { %v2362_v16 = vmul.f32 -1.442695, %v1790_v35  ;;  %v1791_v8 = vadd.f32 %v1740_v29, %v3957_v61  ;;  %v1793_v32 = vadd.f32 %v1783_v17, %v3960_v12 }
 0x662   :  { %v1742_v10 = vpop.f32.mrf.mxu0  ;;  %v1785_v37 = vpop.f32.mrf.mxu1 }
 0x663   :  { %2721 = vpow2.f32 %v2362_v16  ;;  %v2364_v14 = vmul.f32 -1.442695, %v1791_v8  ;;  %v1794_v25 = vadd.f32 %v1742_v10, %v3958_v13  ;;  %v2366_v18 = vmul.f32 -1.442695, %v1793_v32 }
 0x664   :  { %v1744_v22 = vpop.f32.mrf.mxu0  ;;  %v1787_v52 = vpop.f32.mrf.mxu1  ;;  %v1796_v0 = vadd.f32 %v1785_v37, %v3963_v6 }
 0x665   :  { %2723 = vpow2.f32 %v2364_v14  ;;  %v2363_v28 = vmul.f32 -1.442695, %v1794_v25  ;;  %v1795_v30 = vadd.f32 %v1744_v22, %v3959_v36  ;;  %v1797_v43 = vadd.f32 %v1787_v52, %v3962_v38 }
 0x667   :  { %2725 = vpow2.f32 %v2363_v28  ;;  %v2365_v26 = vmul.f32 -1.442695, %v1795_v30  ;;  %v2367_v15 = vmul.f32 -1.442695, %v1797_v43 }
 0x669   :  { %2727 = vpow2.f32 %v2365_v26 }
 0x66a   :  { %2729 = vtanh.f32 %v1792_v21 }
 0x66b   :  { %2731 = vpow2.f32 %v2366_v18 }
 0x670   :  { %v2722_v31 = vpop.eup %2721 }
 0x671   :  { %v1804_v19 = vadd.f32 1.0, %v2722_v31 }
 0x672   :  { %v2724_v33 = vpop.eup %2723 }
 0x673   :  { %2733 = vrcp.f32 %v1804_v19  ;;  %v1816_v35 = vadd.f32 1.0, %v2724_v33 }
 0x674   :  { %v2726_v29 = vpop.eup %2725  ;;  %2735 = vtanh.f32 %v1796_v0 }
 0x675   :  { %2737 = vrcp.f32 %v1816_v35  ;;  %v1805_v16 = vadd.f32 1.0, %v2726_v29 }
 0x676   :  { %v2728_v61 = vpop.eup %2727  ;;  %2739 = vpow2.f32 %v2367_v15 }
 0x677   :  { %2741 = vrcp.f32 %v1805_v16  ;;  %v1817_v23 = vadd.f32 1.0, %v2728_v61  ;;  %v2730_v8 = vpop.eup %2729 }
 0x678   :  { %v2732_v10 = vpop.eup %2731 }
 0x679   :  { %2743 = vrcp.f32 %v1817_v23  ;;  %v1830_v30 = vadd.f32 1.0, %v2732_v10 }
 0x67b   :  { %2745 = vrcp.f32 %v1830_v30 }
 0x680   :  { %v2734_v14 = vpop.eup %2733 }
 0x681   :  { %v2736_v17 = vpop.eup %2735  ;;  %v1838_v13 = vmul.f32 %v2734_v14, %v2730_v8 }
 0x682   :  { %v2738_v25 = vpop.eup %2737 }
 0x683   :  { %v2740_v22 = vpop.eup %2739  ;;  %v1836_v28 = vmul.f32 %v2738_v25, %v3733_v7 }
 0x684   :  { %v2742_v36 = vpop.eup %2741  ;;  %v1831_v32 = vadd.f32 1.0, %v2740_v22 }
 0x685   :  { %v3783_v37 = vadd.f32 %v1838_v13, %v1836_v28  ;;  %v1839_v26 = vmul.f32 %v2742_v36, %v2736_v17 }
 0x686   :  { %v2744_v12 = vpop.eup %2743 }
 0x687   :  { %v1837_v52 = vmul.f32 %v2744_v12, %v3736_v34  ;;  %2747 = vtanh.f32 %v3783_v37 }
 0x688   :  { %2749 = vrcp.f32 %v1831_v32  ;;  %v2746_v21 = vpop.eup %2745 }
 0x689   :  { %v3786_v24 = vadd.f32 %v1839_v26, %v1837_v52 }
 0x68b   :  { %2751 = vtanh.f32 %v3786_v24 }
 0x694   :  { %v2748_v18 = vpop.eup %2747 }
 0x695   :  { %v2750_v7 = vpop.eup %2749  ;;  %v1844_v43 = vmul.f32 %v2748_v18, %v2746_v21 }
 0x698   :  { %v2752_v38 = vpop.eup %2751 }
 0x699   :  { %v1845_v31 = vmul.f32 %v2752_v38, %v2750_v7 }
 0x69b   :  { %v1846_v6 = vpack.c.bf16 %v1845_v31, %v1844_v43 }
 0x69d   :  { %2431 = vst [vmem:[#allocation14 + $0x28] sm:$0xff] %v1846_v6   ;;  %1901 = vmatmul.mubr.bf16.vlgmr.msra.gmra.mxu0 %v1846_v6  ;;  %1944 = vmatmul.mubr.bf16.vlgmr.msra.gmra.mxu1 %v1846_v6 }
 0x69e   :  { %2033 = vmatpush1.bf16.msra.mxu0 %v3580_v39  ;;  %2076 = vmatpush1.bf16.msra.mxu1 %v3583_v20  ;;  %v3964_v39 = vld [vmem:[#allocation58_spill] sm:$0xff] }
 0x69f   :  { %2034 = vmatprep.subr.bf16.mxu0 %v3586_v40  ;;  %2077 = vmatprep.subr.bf16.mxu1 %v3589_v41 }
 0x6a0   :  { %2064 = vmatprep.mubr.bf16.mxu0 %v3928_v27  ;;  %2107 = vmatprep.mubr.bf16.mxu1 %v3928_v27 }
 0x6a2   :  { %2035 = vmatpush1.bf16.msra.mxu0 %v3594_v42  ;;  %2078 = vmatpush1.bf16.msra.mxu1 %v3597_v44  ;;  %v3965_v44 = vld [vmem:[#allocation60_spill] sm:$0xff] }
 0x6a3   :  { %2036 = vmatprep.subr.bf16.mxu0 %v3600_v45  ;;  %2079 = vmatprep.subr.bf16.mxu1 %v3603_v46 }
 0x6a6   :  { %2037 = vmatpush1.bf16.msra.mxu0 %v3606_v47  ;;  %2080 = vmatpush1.bf16.msra.mxu1 %v3609_v48 }
 0x6a7   :  { %2038 = vmatprep.subr.bf16.mxu0 %v3612_v49  ;;  %2081 = vmatprep.subr.bf16.mxu1 %v3615_v50  ;;  %v3966_v49 = vld [vmem:[#allocation62_spill] sm:$0xff] }
 0x6aa   :  { %2039 = vmatpush1.bf16.msra.mxu0 %v3618_v51  ;;  %2082 = vmatpush1.bf16.msra.mxu1 %v3621_v53 }
 0x6ab   :  { %2040 = vmatprep.subr.bf16.mxu0 %v3624_v54  ;;  %2083 = vmatprep.subr.bf16.mxu1 %v3627_v55  ;;  %v3967_v54 = vld [vmem:[#allocation64_spill] sm:$0xff] }
 0x6ae   :  { %2041 = vmatpush1.bf16.msra.mxu0 %v3630_v56  ;;  %2084 = vmatpush1.bf16.msra.mxu1 %v3633_v57 }
 0x6af   :  { %2042 = vmatprep.subr.bf16.mxu0 %v3636_v58  ;;  %2085 = vmatprep.subr.bf16.mxu1 %v3639_v59  ;;  %v3968_v58 = vld [vmem:[#allocation61_spill] sm:$0xff] }
 0x6b2   :  { %2043 = vmatpush1.bf16.msra.mxu0 %v3642_v60  ;;  %2086 = vmatpush1.bf16.msra.mxu1 %v3645_v62  ;;  %v3969_v62 = vld [vmem:[#allocation59_spill] sm:$0xff] }
 0x6b3   :  { %2044 = vmatprep.subr.bf16.mxu0 %v3648_v63  ;;  %2087 = vmatprep.subr.bf16.mxu1 %v3651_v1 }
 0x6b6   :  { %2045 = vmatpush1.bf16.msra.mxu0 %v3654_v2  ;;  %2088 = vmatpush1.bf16.msra.mxu1 %v3657_v3  ;;  %v3970_v2 = vld [vmem:[#allocation65_spill] sm:$0xff] }
 0x6b7   :  { %2046 = vmatprep.subr.bf16.mxu0 %v3660_v4  ;;  %2089 = vmatprep.subr.bf16.mxu1 %v3663_v5  ;;  %v3971_v5 = vld [vmem:[#allocation63_spill] sm:$0xff] }
 0x6ba   :  { %2047 = vmatpush1.bf16.msra.mxu0 %v3666_v9  ;;  %2090 = vmatpush1.bf16.msra.mxu1 %v3669_v11 }
 0x75d   :  { %v1902_v27 = vpop.f32.mrf.mxu0  ;;  %v1945_v40 = vpop.f32.mrf.mxu1 }
 0x75e   :  { %v1954_v20 = vadd.f32 %v1902_v27, %v3964_v39  ;;  %v1956_v63 = vadd.f32 %v1945_v40, %v3969_v62  ;;  %v3973_v40 = vld [vmem:[#allocation68_spill] sm:$0xff]  ;;  %v3978_v62 = vld [vmem:[#allocation73_spill] sm:$0xff] }
 0x75f   :  { %v1904_v41 = vpop.f32.mrf.mxu0  ;;  %v1947_v48 = vpop.f32.mrf.mxu1 }
 0x760   :  { %v2370_v42 = vmul.f32 -1.442695, %v1954_v20  ;;  %v1955_v45 = vadd.f32 %v1904_v41, %v3965_v44  ;;  %v1957_v59 = vadd.f32 %v1947_v48, %v3968_v58  ;;  %v3977_v58 = vld [vmem:[#allocation67_spill] sm:$0xff] }
 0x761   :  { %v1906_v46 = vpop.f32.mrf.mxu0  ;;  %v1949_v56 = vpop.f32.mrf.mxu1 }
 0x762   :  { %2753 = vpow2.f32 %v2370_v42  ;;  %v2372_v47 = vmul.f32 -1.442695, %v1955_v45  ;;  %v1958_v50 = vadd.f32 %v1906_v46, %v3966_v49  ;;  %v2374_v1 = vmul.f32 -1.442695, %v1957_v59  ;;  %v3974_v46 = vld [vmem:[#allocation70_spill] sm:$0xff] }
 0x763   :  { %v1908_v51 = vpop.f32.mrf.mxu0  ;;  %v1951_v60 = vpop.f32.mrf.mxu1  ;;  %v1960_v9 = vadd.f32 %v1949_v56, %v3971_v5 }
 0x764   :  { %2755 = vpow2.f32 %v2372_v47  ;;  %v2371_v53 = vmul.f32 -1.442695, %v1958_v50  ;;  %v1959_v55 = vadd.f32 %v1908_v51, %v3967_v54  ;;  %v1961_v3 = vadd.f32 %v1951_v60, %v3970_v2  ;;  %v3975_v50 = vld [vmem:[#allocation72_spill] sm:$0xff]  ;;  %v3979_v2 = vld [vmem:[#allocation71_spill] sm:$0xff] }
 0x766   :  { %2757 = vpow2.f32 %v2371_v53  ;;  %v2373_v57 = vmul.f32 -1.442695, %v1959_v55  ;;  %v2375_v0 = vmul.f32 -1.442695, %v1961_v3  ;;  %v3976_v55 = vld [vmem:[#allocation69_spill] sm:$0xff] }
 0x768   :  { %2759 = vpow2.f32 %v2373_v57 }
 0x769   :  { %2761 = vtanh.f32 %v1956_v63 }
 0x76a   :  { %2763 = vpow2.f32 %v2374_v1 }
 0x76f   :  { %v2754_v4 = vpop.eup %2753 }
 0x770   :  { %v1968_v11 = vadd.f32 1.0, %v2754_v4 }
 0x771   :  { %v2756_v34 = vpop.eup %2755 }
 0x772   :  { %2765 = vrcp.f32 %v1968_v11  ;;  %v1980_v19 = vadd.f32 1.0, %v2756_v34 }
 0x773   :  { %v2758_v33 = vpop.eup %2757  ;;  %2767 = vtanh.f32 %v1960_v9 }
 0x774   :  { %2769 = vrcp.f32 %v1980_v19  ;;  %v1969_v15 = vadd.f32 1.0, %v2758_v33 }
 0x775   :  { %v2760_v35 = vpop.eup %2759  ;;  %2771 = vpow2.f32 %v2375_v0 }
 0x776   :  { %2773 = vrcp.f32 %v1969_v15  ;;  %v1981_v29 = vadd.f32 1.0, %v2760_v35  ;;  %v2762_v16 = vpop.eup %2761 }
 0x777   :  { %v2764_v61 = vpop.eup %2763 }
 0x778   :  { %2775 = vrcp.f32 %v1981_v29  ;;  %v1994_v22 = vadd.f32 1.0, %v2764_v61 }
 0x77a   :  { %2777 = vrcp.f32 %v1994_v22 }
 0x77f   :  { %v2766_v23 = vpop.eup %2765 }
 0x780   :  { %v2768_v8 = vpop.eup %2767  ;;  %v2002_v10 = vmul.f32 %v2766_v23, %v2762_v16 }
 0x781   :  { %v2770_v14 = vpop.eup %2769 }
 0x782   :  { %v2772_v17 = vpop.eup %2771  ;;  %v2000_v13 = vmul.f32 %v2770_v14, %v3783_v37 }
 0x783   :  { %v2774_v25 = vpop.eup %2773  ;;  %v1995_v26 = vadd.f32 1.0, %v2772_v17 }
 0x784   :  { %v3831_v28 = vadd.f32 %v2002_v10, %v2000_v13  ;;  %v2003_v36 = vmul.f32 %v2774_v25, %v2768_v8 }
 0x785   :  { %v2776_v30 = vpop.eup %2775 }
 0x786   :  { %v2001_v12 = vmul.f32 %v2776_v30, %v3786_v24  ;;  %2779 = vtanh.f32 %v3831_v28  ;;  %v3972_v24 = vld [vmem:[#allocation66_spill] sm:$0xff] }
 0x787   :  { %2781 = vrcp.f32 %v1995_v26  ;;  %v2778_v52 = vpop.eup %2777 }
 0x788   :  { %v3834_v32 = vadd.f32 %v2003_v36, %v2001_v12 }
 0x78a   :  { %2783 = vtanh.f32 %v3834_v32 }
 0x793   :  { %v2780_v21 = vpop.eup %2779 }
 0x794   :  { %v2782_v37 = vpop.eup %2781  ;;  %v2008_v7 = vmul.f32 %v2780_v21, %v2778_v52 }
 0x797   :  { %v2784_v18 = vpop.eup %2783 }
 0x798   :  { %v2009_v38 = vmul.f32 %v2784_v18, %v2782_v37 }
 0x79a   :  { %v2010_v43 = vpack.c.bf16 %v2009_v38, %v2008_v7 }
 0x79c   :  { %2436 = vst [vmem:[#allocation14 + $0x30] sm:$0xff] %v2010_v43   ;;  %2065 = vmatmul.mubr.bf16.vlgmr.msra.gmra.mxu0 %v2010_v43  ;;  %2108 = vmatmul.mubr.bf16.vlgmr.msra.gmra.mxu1 %v2010_v43 }
 0x85c   :  { %v2066_v31 = vpop.f32.mrf.mxu0  ;;  %v2109_v27 = vpop.f32.mrf.mxu1 }
 0x85d   :  { %v2118_v6 = vadd.f32 %v2066_v31, %v3972_v24  ;;  %v2120_v59 = vadd.f32 %v2109_v27, %v3977_v58 }
 0x85e   :  { %v2068_v39 = vpop.f32.mrf.mxu0  ;;  %v2111_v45 = vpop.f32.mrf.mxu1 }
 0x85f   :  { %v2378_v20 = vmul.f32 -1.442695, %v2118_v6  ;;  %v2119_v41 = vadd.f32 %v2068_v39, %v3973_v40  ;;  %v2121_v56 = vadd.f32 %v2111_v45, %v3976_v55 }
 0x860   :  { %v2070_v42 = vpop.f32.mrf.mxu0  ;;  %v2113_v53 = vpop.f32.mrf.mxu1 }
 0x861   :  { %2785 = vpow2.f32 %v2378_v20  ;;  %v2380_v44 = vmul.f32 -1.442695, %v2119_v41  ;;  %v2122_v47 = vadd.f32 %v2070_v42, %v3974_v46  ;;  %v2382_v60 = vmul.f32 -1.442695, %v2121_v56 }
 0x862   :  { %v2072_v48 = vpop.f32.mrf.mxu0  ;;  %v2115_v57 = vpop.f32.mrf.mxu1  ;;  %v2124_v3 = vadd.f32 %v2113_v53, %v3979_v2 }
 0x863   :  { %2787 = vpow2.f32 %v2380_v44  ;;  %v2379_v49 = vmul.f32 -1.442695, %v2122_v47  ;;  %v2123_v51 = vadd.f32 %v2072_v48, %v3975_v50  ;;  %v2125_v63 = vadd.f32 %v2115_v57, %v3978_v62 }
 0x865   :  { %2789 = vpow2.f32 %v2379_v49  ;;  %v2381_v54 = vmul.f32 -1.442695, %v2123_v51  ;;  %v2383_v9 = vmul.f32 -1.442695, %v2125_v63 }
 0x867   :  { %2791 = vpow2.f32 %v2381_v54 }
 0x868   :  { %2793 = vtanh.f32 %v2120_v59 }
 0x869   :  { %2795 = vpow2.f32 %v2382_v60 }
 0x86e   :  { %v2786_v1 = vpop.eup %2785 }
 0x86f   :  { %v2132_v4 = vadd.f32 1.0, %v2786_v1 }
 0x870   :  { %v2788_v5 = vpop.eup %2787 }
 0x871   :  { %2797 = vrcp.f32 %v2132_v4  ;;  %v2144_v11 = vadd.f32 1.0, %v2788_v5 }
 0x872   :  { %v2790_v34 = vpop.eup %2789  ;;  %2799 = vtanh.f32 %v2124_v3 }
 0x873   :  { %2801 = vrcp.f32 %v2144_v11  ;;  %v2133_v0 = vadd.f32 1.0, %v2790_v34 }
 0x874   :  { %v2792_v19 = vpop.eup %2791  ;;  %2803 = vpow2.f32 %v2383_v9 }
 0x875   :  { %2805 = vrcp.f32 %v2133_v0  ;;  %v2145_v33 = vadd.f32 1.0, %v2792_v19  ;;  %v2794_v15 = vpop.eup %2793 }
 0x876   :  { %v2796_v35 = vpop.eup %2795 }
 0x877   :  { %2807 = vrcp.f32 %v2145_v33  ;;  %v2158_v8 = vadd.f32 1.0, %v2796_v35 }
 0x879   :  { %2809 = vrcp.f32 %v2158_v8 }
 0x87e   :  { %v2798_v29 = vpop.eup %2797 }
 0x87f   :  { %v2800_v16 = vpop.eup %2799  ;;  %v2166_v61 = vmul.f32 %v2798_v29, %v2794_v15 }
 0x880   :  { %v2802_v23 = vpop.eup %2801 }
 0x881   :  { %v2804_v10 = vpop.eup %2803  ;;  %v2164_v14 = vmul.f32 %v2802_v23, %v3831_v28 }
 0x882   :  { %v2806_v17 = vpop.eup %2805  ;;  %v2159_v36 = vadd.f32 1.0, %v2804_v10 }
 0x883   :  { %v2167_v13 = vmul.f32 %v2806_v17, %v2800_v16  ;;  %v2168_v25 = vadd.f32 %v2166_v61, %v2164_v14 }
 0x884   :  { %v2808_v22 = vpop.eup %2807 }
 0x885   :  { %v2165_v30 = vmul.f32 %v2808_v22, %v3834_v32  ;;  %2811 = vtanh.f32 %v2168_v25  ;;  %2191 = vst [vmem:[#allocation17] sm:$0xff] %v2168_v25 }
 0x886   :  { %2813 = vrcp.f32 %v2159_v36  ;;  %v2810_v12 = vpop.eup %2809 }
 0x887   :  { %v2169_v26 = vadd.f32 %v2167_v13, %v2165_v30 }
 0x889   :  { %2815 = vtanh.f32 %v2169_v26  ;;  %2192 = vst [vmem:[#allocation17 + $0x8] sm:$0xff] %v2169_v26 }
 0x892   :  { %v2812_v52 = vpop.eup %2811 }
 0x893   :  { %v2172_v21 = vmul.f32 %v2812_v52, %v2810_v12  ;;  %v2814_v28 = vpop.eup %2813 }
 0x895   :  { %2189 = vst [vmem:[#allocation15] sm:$0xff] %v2172_v21 }
 0x896   :  { %v2816_v37 = vpop.eup %2815 }
 0x897   :  { %v2173_v18 = vmul.f32 %v2816_v37, %v2814_v28 }
 0x899   :  { %v2440_v32 = vpack.c.bf16 %v2173_v18, %v2172_v21  ;;  %2190 = vst [vmem:[#allocation15 + $0x8] sm:$0xff] %v2173_v18 }
 0x89a   :  { %2960 = shalt.err (!%p2957_p1)
}
 0x89b   :  { %2216 = dma.vmem_to_hbm [thread:$0]  %s2211_s30, 256, %s3873_s7, [#allocation16], %s3023_s15, %s3023_s15, %s3024_s16   ;;  %2441 = vst [vmem:[#allocation14 + $0x38] sm:$0xff] %v2440_v32  }
 0x89c   :  { %s2969_s20 = scalar_lea.vmem %s2223_s13, 256  ;;  %p2974_p3 = scmp.lt.s32.totalorder %s2223_s13, %s2223_s13 }
 0x89d   :  { %p2970_p2 = scmp.ne.s32.totalorder %s2223_s13, %s2969_s20  ;;  %p2975_p4 = scmp.lt.s32.totalorder %s2969_s20, %s2969_s20 }
 0x89f   :  { %p2976_p5 = por %p2975_p4, %p2974_p3 }
 0x8a1   :  { %p2977_p6 = pnand %p2976_p5, %p2970_p2 }
 0x8a3   :  { %2980 = shalt.err (!%p2977_p6)
}
 0x8a4   :  { %2228 = dma.vmem_to_hbm [thread:$0]  %s2223_s13, 256, %s3874_s8, [#allocation16], %s3023_s15, %s3023_s15, %s3024_s16  }
 0x8a5   :  { %s2989_s4 = scalar_lea.vmem %s2199_s17, 1024  ;;  %p2994_p8 = scmp.lt.s32.totalorder %s2199_s17, %s2199_s17 }
 0x8a6   :  { %p2990_p7 = scmp.ne.s32.totalorder %s2199_s17, %s2989_s4  ;;  %p2995_p9 = scmp.lt.s32.totalorder %s2989_s4, %s2989_s4 }
 0x8a8   :  { %p2996_p10 = por %p2995_p9, %p2994_p8 }
 0x8aa   :  { %p2997_p11 = pnand %p2996_p10, %p2990_p7 }
 0x8ac   :  { %3000 = shalt.err (!%p2997_p11)
}
 0x8ad   :  { %2204 = dma.vmem_to_hbm [thread:$0]  %s2199_s17, 1024, %s3872_s6, [#allocation7], %s3026_s21, %s3026_s21, %s3027_s22  }
 0x8ae   :  { %3015 = dma.done.wait [#allocation7], 1024  }
 0x8af   :  { %3016 = vsyncadd [#allocation7], 4294966272 }
 0x8b0   :  { %3017 = dma.done.wait [#allocation16], 512  }
 0x8b1   :  { %3018 = vsyncadd [#allocation16], 4294966784 }
 0x8b2   :  { %2238 = vsyncpa [#allocation6], 1 }
 0x8b3   :  { %2239 = vsyncpa [#allocation9], 1 }
 0x8b4   :  { %2240 = vsyncpa [#allocation12], 1 }
 0x8b5   :  { %2241 = vsyncpa [#allocation7], 1 }
 0x8b6   :  { %2242 = vsyncpa [#allocation16], 1 }

</bundles_post_ra>
